<compile_context>
chip_gen: v5e
topology: v5e:2x2
jax: 0.10.0
libtpu: 0.0.40
codegen_flags: <defaults>
</compile_context>

<pallas_src>
import math
import functools

import jax
import jax.numpy as jnp
from jax.experimental import pallas as pl
from jax.experimental.pallas import tpu as pltpu


# ----------------------------- helpers (in-kernel) -----------------------------

def _gelu(x):
    # exact (erf) GELU, matching nn.GELU() default
    return 0.5 * x * (1.0 + jax.lax.erf(x * (1.0 / math.sqrt(2.0))))


def _layernorm(x, gamma, beta, eps=1e-5):
    mu = jnp.mean(x, axis=-1, keepdims=True)
    var = jnp.mean((x - mu) ** 2, axis=-1, keepdims=True)
    return (x - mu) * jax.lax.rsqrt(var + eps) * gamma + beta


# ------------------------------ fused kernel -----------------------------------
# emb-conv (2 matmuls) -> tAPE -> attention (packed heads) -> FFN, whole batch.

def fused_transformer_kernel(xcol_ref, w1_ref, b1_ref, w2_ref, b2_ref, pe_ref,
                             wq_ref, wk_ref, wv_ref,
                             mk_ref, mv_ref, seg_ref, bias_ref,
                             g_out_ref, b_out_ref, g_ln1_ref, b_ln1_ref,
                             wf1_ref, bf1_ref, wf2_ref, bf2_ref,
                             g_ln2_ref, b_ln2_ref, out_ref,
                             *, B, S, H, scale):
    f32 = jnp.float32

    # ---- EmbConvBlock: im2col matmuls on the MXU, BN folded into W/b ----
    h = _gelu(jnp.dot(xcol_ref[...], w1_ref[...],
                      preferred_element_type=f32) + b1_ref[...])          # (B*S, Cin*Hc)
    emb = _gelu(jnp.dot(h, w2_ref[...],
                        preferred_element_type=f32) + b2_ref[...])        # (B*S, E)

    # ---- tAPE (dropout = identity at inference) ----
    x = emb + jnp.concatenate([pe_ref[...]] * B, axis=0)                  # (B*S, E)

    # ---- Attention projections, batch-fused ----
    q = jnp.dot(x, wq_ref[...], preferred_element_type=f32)
    k = jnp.dot(x, wk_ref[...], preferred_element_type=f32)
    v = jnp.dot(x, wv_ref[...], preferred_element_type=f32)

    # hoisted constants (loaded once)
    mk = mk_ref[...]        # (E, H*S)   head mask for packed K
    mv = mv_ref[...]        # (H*S, E)   head mask for packed V
    seg = seg_ref[...]      # (H*S, H*S) block-diagonal ones (segment sums)
    bias = bias_ref[...]    # (S, H*S)   relative position bias, head-packed

    outs = []
    for b in range(B):      # static unroll over the (tiny) batch
        qb = q[b * S:(b + 1) * S]
        kb = k[b * S:(b + 1) * S]
        vb = v[b * S:(b + 1) * S]
        # packed per-head scores: (S, E) @ (E, H*S) -> (S, H*S), lane-dense
        kp = jnp.concatenate([kb.T] * H, axis=1) * mk
        s = jnp.dot(qb, kp, preferred_element_type=f32) * scale
        s = s - jnp.max(s, axis=-1, keepdims=True)     # per-row const: softmax-invariant
        p = jnp.exp(s)
        l = jnp.dot(p, seg, preferred_element_type=f32)          # per-head sums, replicated
        p = p * pl.reciprocal(l, approx=True) + bias             # bias added AFTER softmax
        vp = jnp.concatenate([vb] * H, axis=0) * mv              # (H*S, E)
        outs.append(jnp.dot(p, vp, preferred_element_type=f32))  # (S, E)
    attn = jnp.concatenate(outs, axis=0)                         # (B*S, E)

    # Attention.to_out LayerNorm + add&norm
    o = _layernorm(attn, g_out_ref[...], b_out_ref[...])
    x2 = _layernorm(x + o, g_ln1_ref[...], b_ln1_ref[...])

    # FeedForward: Linear -> ReLU -> (Dropout) -> Linear -> (Dropout) -> add&norm
    hid = jnp.maximum(
        jnp.dot(x2, wf1_ref[...], preferred_element_type=f32) + bf1_ref[...], 0.0)
    y = jnp.dot(hid, wf2_ref[...], preferred_element_type=f32) + bf2_ref[...]
    out_ref[...] = _layernorm(x2 + y, g_ln2_ref[...], b_ln2_ref[...])


# ------------------------------- wrapper --------------------------------

def _full_spec(a):
    nd = a.ndim
    return pl.BlockSpec(a.shape, lambda i, _nd=nd: (0,) * _nd)


def transformer_forward(x, p, *, num_heads):
    B, T, Cin = x.shape
    KCin, CinHc = p["w1f"].shape
    K = KCin // Cin
    E = p["w2f"].shape[1]
    scale = float(E) ** -0.5

    # PyTorch 'same' padding for even kernel K: left=(K-1)//2, right=K-1-left
    padl = (K - 1) // 2
    xp = jnp.pad(x, ((0, 0), (padl, K - 1 - padl), (0, 0)))
    # im2col (layout only): xcol[b*T+t, k*Cin+c] = xp[b, t+k, c]
    xcol = jnp.stack([xp[:, k:k + T, :] for k in range(K)], axis=2).reshape(B * T, K * Cin)

    inputs = [xcol, p["w1f"], p["b1f"], p["w2f"], p["b2f"], p["pe"],
              p["wqT"], p["wkT"], p["wvT"],
              p["mask_k"], p["mask_v"], p["seg_ones"], p["bias_packed"],
              p["g_to_out"], p["b_to_out"], p["g_ln_attn"], p["b_ln_attn"],
              p["wf1T"], p["bf1"], p["wf2T"], p["bf2"],
              p["g_ln_ffn"], p["b_ln_ffn"]]

    out = pl.pallas_call(
        functools.partial(fused_transformer_kernel, B=B, S=T, H=num_heads, scale=scale),
        out_shape=jax.ShapeDtypeStruct((B * T, E), jnp.float32),
        grid=(1,),                                   # single step: whole batch at once
        in_specs=[_full_spec(a) for a in inputs],
        out_specs=pl.BlockSpec((B * T, E), lambda i: (0, 0)),
        compiler_params=pltpu.CompilerParams(dimension_semantics=("arbitrary",)),
    )(*inputs)
    return out.reshape(B, T, E)


# --------------------------- parameter setup ----------------------------

def make_params(key, *, emb_size, num_heads, hidden_ffn, in_channel, seq_length, t_kernel):
    E, H, Hff, Cin, S, K = emb_size, num_heads, hidden_ffn, in_channel, seq_length, t_kernel
    Hc = E * 4                       # EmbConvBlock hidden channels
    dh = E // H
    ks = jax.random.split(key, 16)

    def rnd(k, shape, scl=0.1):
        return jax.random.normal(k, shape, jnp.float32) * scl

    # --- EmbConvBlock raw params (torch layouts) + BN running stats (eval) ---
    w_conv1 = rnd(ks[0], (Hc, 1, K, 1)); b_conv1 = rnd(ks[1], (Hc,))
    w_conv2 = rnd(ks[2], (E, Hc, 1, Cin)); b_conv2 = rnd(ks[3], (E,))
    bn1_g = jnp.ones((Hc,), jnp.float32); bn1_b = jnp.zeros((Hc,), jnp.float32)
    bn1_m = rnd(ks[12], (Hc,), 0.05);     bn1_v = 1.0 + jnp.abs(rnd(ks[13], (Hc,), 0.05))
    bn2_g = jnp.ones((E,), jnp.float32);  bn2_b = jnp.zeros((E,), jnp.float32)
    bn2_m = rnd(ks[14], (E,), 0.05);      bn2_v = 1.0 + jnp.abs(rnd(ks[15], (E,), 0.05))

    # fold conv1 + BN1 into one block-diagonal (K*Cin, Cin*Hc) matmul weight
    w1 = w_conv1[:, 0, :, 0]                                   # (Hc, K)
    s1 = bn1_g * jax.lax.rsqrt(bn1_v + 1e-5)                   # (Hc,)
    w1bd = jnp.einsum('hk,cd->kcdh', w1,
                      jnp.eye(Cin, dtype=jnp.float32)).reshape(K * Cin, Cin * Hc)
    w1f = w1bd * jnp.tile(s1, Cin)[None, :]
    b1f = jnp.tile((b_conv1 - bn1_m) * s1 + bn1_b, Cin)[None, :]      # (1, Cin*Hc)

    # fold conv2 + BN2 into one (Cin*Hc, E) matmul weight
    w2 = jnp.transpose(w_conv2[:, :, 0, :], (2, 1, 0)).reshape(Cin * Hc, E)
    s2 = bn2_g * jax.lax.rsqrt(bn2_v + 1e-5)
    w2f = w2 * s2[None, :]
    b2f = ((b_conv2 - bn2_m) * s2 + bn2_b)[None, :]                   # (1, E)

    # tAPE positional encoding (max_len == seq_length, scale_factor = 1.0)
    position = jnp.arange(S, dtype=jnp.float32)[:, None]
    div_term = jnp.exp(jnp.arange(0, E, 2, dtype=jnp.float32) * (-math.log(10000.0) / E))
    pe = jnp.zeros((S, E), jnp.float32)
    pe = pe.at[:, 0::2].set(jnp.sin(position * div_term * (E / S)))
    pe = pe.at[:, 1::2].set(jnp.cos(position * div_term * (E / S)))

    # attention
    wq = rnd(ks[4], (E, E)); wk = rnd(ks[5], (E, E)); wv = rnd(ks[6], (E, E))
    rel_table = rnd(ks[7], (2 * S - 1, H), 0.01)   # torch inits zeros; nonzero exercises path
    idx = jnp.arange(S)
    rel_index = idx[:, None] - idx[None, :] + S - 1                   # (S, S)
    # packed as bias[i, h*S + j] = table[i - j + S - 1, h]
    bias_packed = jnp.transpose(rel_table[rel_index], (0, 2, 1)).reshape(S, H * S)

    # head-packing constants (lane-dense attention)
    e_head = jnp.arange(E) // dh                                      # head of emb column
    c_head = jnp.arange(H * S) // S                                   # head of packed column
    mask_k = (e_head[:, None] == c_head[None, :]).astype(jnp.float32)     # (E, H*S)
    mask_v = mask_k.T                                                     # (H*S, E)
    seg_ones = (c_head[:, None] == c_head[None, :]).astype(jnp.float32)   # (H*S, H*S)

    # feed-forward + layernorms
    wf1 = rnd(ks[8], (Hff, E)); bf1 = rnd(ks[9], (Hff,))
    wf2 = rnd(ks[10], (E, Hff)); bf2 = rnd(ks[11], (E,))
    row = lambda a: a[None, :]
    ones_e = jnp.ones((E,), jnp.float32); zeros_e = jnp.zeros((E,), jnp.float32)

    return dict(
        w1f=w1f, b1f=b1f, w2f=w2f, b2f=b2f, pe=pe,
        wqT=wq.T, wkT=wk.T, wvT=wv.T,
        mask_k=mask_k, mask_v=mask_v, seg_ones=seg_ones, bias_packed=bias_packed,
        g_to_out=row(ones_e), b_to_out=row(zeros_e),
        g_ln_attn=row(ones_e), b_ln_attn=row(zeros_e),
        wf1T=wf1.T, bf1=row(bf1), wf2T=wf2.T, bf2=row(bf2),
        g_ln_ffn=row(ones_e), b_ln_ffn=row(zeros_e),
    )


if __name__ == "__main__":
    # small shapes consistent with the module (emb_size=16, num_heads=8)
    B, T, Cin = 2, 16, 4            # batch, time (== seq_length), in_channel
    E, H, Hff, K = 16, 8, 64, 8     # emb, heads, FFN hidden, temporal kernel size

    key = jax.random.PRNGKey(0)
    k_param, k_data = jax.random.split(key)
    params = make_params(k_param, emb_size=E, num_heads=H, hidden_ffn=Hff,
                         in_channel=Cin, seq_length=T, t_kernel=K)
    x = jax.random.normal(k_data, (B, T, Cin), jnp.float32)

    out = transformer_forward(x, params, num_heads=H)
    out = jax.block_until_ready(out)
    assert out.shape == (B, T, E) and bool(jnp.all(jnp.isfinite(out)))
    # TODO(synk): Dropout layers are identity (inference); BatchNorm uses running stats
    #             (folded into conv weights at parameter-prep time).
    print("KERNEL_OK")
</pallas_src>

<mosaic_0001>
module attributes {stable_mosaic.version = 11 : i64} {
  func.func @fused_transformer_kernel(%arg0: i32, %arg1: memref<32x32xf32, #tpu.memory_space<vmem>>, %arg2: memref<32x256xf32, #tpu.memory_space<vmem>>, %arg3: memref<1x256xf32, #tpu.memory_space<vmem>>, %arg4: memref<256x16xf32, #tpu.memory_space<vmem>>, %arg5: memref<1x16xf32, #tpu.memory_space<vmem>>, %arg6: memref<16x16xf32, #tpu.memory_space<vmem>>, %arg7: memref<16x16xf32, #tpu.memory_space<vmem>>, %arg8: memref<16x16xf32, #tpu.memory_space<vmem>>, %arg9: memref<16x16xf32, #tpu.memory_space<vmem>>, %arg10: memref<16x128xf32, #tpu.memory_space<vmem>>, %arg11: memref<128x16xf32, #tpu.memory_space<vmem>>, %arg12: memref<128x128xf32, #tpu.memory_space<vmem>>, %arg13: memref<16x128xf32, #tpu.memory_space<vmem>>, %arg14: memref<1x16xf32, #tpu.memory_space<vmem>>, %arg15: memref<1x16xf32, #tpu.memory_space<vmem>>, %arg16: memref<1x16xf32, #tpu.memory_space<vmem>>, %arg17: memref<1x16xf32, #tpu.memory_space<vmem>>, %arg18: memref<16x64xf32, #tpu.memory_space<vmem>>, %arg19: memref<1x64xf32, #tpu.memory_space<vmem>>, %arg20: memref<64x16xf32, #tpu.memory_space<vmem>>, %arg21: memref<1x16xf32, #tpu.memory_space<vmem>>, %arg22: memref<1x16xf32, #tpu.memory_space<vmem>>, %arg23: memref<1x16xf32, #tpu.memory_space<vmem>>, %arg24: memref<32x16xf32, #tpu.memory_space<vmem>>) attributes {dimension_semantics = [#tpu.dimension_semantics<arbitrary>], iteration_bounds = array<i64: 1>, scalar_prefetch = 0 : i64, scratch_operands = 0 : i64, tpu.core_type = #tpu.core_type<tc>, window_params = [{pipeline_mode = #tpu.pipeline_mode<synchronous>, transform_indices = @transform_0, window_bounds = array<i64: 32, 32>}, {pipeline_mode = #tpu.pipeline_mode<synchronous>, transform_indices = @transform_1, window_bounds = array<i64: 32, 256>}, {pipeline_mode = #tpu.pipeline_mode<synchronous>, transform_indices = @transform_2, window_bounds = array<i64: 1, 256>}, {pipeline_mode = #tpu.pipeline_mode<synchronous>, transform_indices = @transform_3, window_bounds = array<i64: 256, 16>}, {pipeline_mode = #tpu.pipeline_mode<synchronous>, transform_indices = @transform_4, window_bounds = array<i64: 1, 16>}, {pipeline_mode = #tpu.pipeline_mode<synchronous>, transform_indices = @transform_5, window_bounds = array<i64: 16, 16>}, {pipeline_mode = #tpu.pipeline_mode<synchronous>, transform_indices = @transform_6, window_bounds = array<i64: 16, 16>}, {pipeline_mode = #tpu.pipeline_mode<synchronous>, transform_indices = @transform_7, window_bounds = array<i64: 16, 16>}, {pipeline_mode = #tpu.pipeline_mode<synchronous>, transform_indices = @transform_8, window_bounds = array<i64: 16, 16>}, {pipeline_mode = #tpu.pipeline_mode<synchronous>, transform_indices = @transform_9, window_bounds = array<i64: 16, 128>}, {pipeline_mode = #tpu.pipeline_mode<synchronous>, transform_indices = @transform_10, window_bounds = array<i64: 128, 16>}, {pipeline_mode = #tpu.pipeline_mode<synchronous>, transform_indices = @transform_11, window_bounds = array<i64: 128, 128>}, {pipeline_mode = #tpu.pipeline_mode<synchronous>, transform_indices = @transform_12, window_bounds = array<i64: 16, 128>}, {pipeline_mode = #tpu.pipeline_mode<synchronous>, transform_indices = @transform_13, window_bounds = array<i64: 1, 16>}, {pipeline_mode = #tpu.pipeline_mode<synchronous>, transform_indices = @transform_14, window_bounds = array<i64: 1, 16>}, {pipeline_mode = #tpu.pipeline_mode<synchronous>, transform_indices = @transform_15, window_bounds = array<i64: 1, 16>}, {pipeline_mode = #tpu.pipeline_mode<synchronous>, transform_indices = @transform_16, window_bounds = array<i64: 1, 16>}, {pipeline_mode = #tpu.pipeline_mode<synchronous>, transform_indices = @transform_17, window_bounds = array<i64: 16, 64>}, {pipeline_mode = #tpu.pipeline_mode<synchronous>, transform_indices = @transform_18, window_bounds = array<i64: 1, 64>}, {pipeline_mode = #tpu.pipeline_mode<synchronous>, transform_indices = @transform_19, window_bounds = array<i64: 64, 16>}, {pipeline_mode = #tpu.pipeline_mode<synchronous>, transform_indices = @transform_20, window_bounds = array<i64: 1, 16>}, {pipeline_mode = #tpu.pipeline_mode<synchronous>, transform_indices = @transform_21, window_bounds = array<i64: 1, 16>}, {pipeline_mode = #tpu.pipeline_mode<synchronous>, transform_indices = @transform_22, window_bounds = array<i64: 1, 16>}, {pipeline_mode = #tpu.pipeline_mode<synchronous>, transform_indices = @transform_23, window_bounds = array<i64: 32, 16>}]} {
    %c0 = arith.constant 0 : index
    %c0_0 = arith.constant 0 : index
    %0 = vector.load %arg1[%c0, %c0_0] : memref<32x32xf32, #tpu.memory_space<vmem>>, vector<32x32xf32>
    %c0_1 = arith.constant 0 : index
    %c0_2 = arith.constant 0 : index
    %1 = vector.load %arg2[%c0_1, %c0_2] : memref<32x256xf32, #tpu.memory_space<vmem>>, vector<32x256xf32>
    %cst = arith.constant dense<0.000000e+00> : vector<32x256xf32>
    %2 = tpu.matmul %0, %1, %cst {dimension_numbers = #tpu.dot_dimension_numbers<[1], [0], [0], [1], [0, 0, 1, 1], [], []>} : vector<32x32xf32>, vector<32x256xf32>, vector<32x256xf32> -> vector<32x256xf32>
    %c0_3 = arith.constant 0 : index
    %c0_4 = arith.constant 0 : index
    %3 = vector.load %arg3[%c0_3, %c0_4] : memref<1x256xf32, #tpu.memory_space<vmem>>, vector<1x256xf32>
    %4 = vector.broadcast %3 : vector<1x256xf32> to vector<32x256xf32>
    %5 = arith.addf %2, %4 : vector<32x256xf32>
    %cst_5 = arith.constant 5.000000e-01 : f32
    %6 = vector.broadcast %cst_5 : f32 to vector<32x256xf32>
    %7 = arith.mulf %6, %5 : vector<32x256xf32>
    %cst_6 = arith.constant 0.707106769 : f32
    %8 = vector.broadcast %cst_6 : f32 to vector<32x256xf32>
    %9 = arith.mulf %5, %8 : vector<32x256xf32>
    %10 = math.erf %9 : vector<32x256xf32>
    %cst_7 = arith.constant 1.000000e+00 : f32
    %11 = vector.broadcast %cst_7 : f32 to vector<32x256xf32>
    %12 = arith.addf %11, %10 : vector<32x256xf32>
    %13 = arith.mulf %7, %12 : vector<32x256xf32>
    %c0_8 = arith.constant 0 : index
    %c0_9 = arith.constant 0 : index
    %14 = vector.load %arg4[%c0_8, %c0_9] : memref<256x16xf32, #tpu.memory_space<vmem>>, vector<256x16xf32>
    %cst_10 = arith.constant dense<0.000000e+00> : vector<32x16xf32>
    %15 = tpu.matmul %13, %14, %cst_10 {dimension_numbers = #tpu.dot_dimension_numbers<[1], [0], [0], [1], [0, 0, 1, 1], [], []>} : vector<32x256xf32>, vector<256x16xf32>, vector<32x16xf32> -> vector<32x16xf32>
    %c0_11 = arith.constant 0 : index
    %c0_12 = arith.constant 0 : index
    %16 = vector.load %arg5[%c0_11, %c0_12] : memref<1x16xf32, #tpu.memory_space<vmem>>, vector<1x16xf32>
    %17 = vector.broadcast %16 : vector<1x16xf32> to vector<32x16xf32>
    %18 = arith.addf %15, %17 : vector<32x16xf32>
    %cst_13 = arith.constant 5.000000e-01 : f32
    %19 = vector.broadcast %cst_13 : f32 to vector<32x16xf32>
    %20 = arith.mulf %19, %18 : vector<32x16xf32>
    %cst_14 = arith.constant 0.707106769 : f32
    %21 = vector.broadcast %cst_14 : f32 to vector<32x16xf32>
    %22 = arith.mulf %18, %21 : vector<32x16xf32>
    %23 = math.erf %22 : vector<32x16xf32>
    %cst_15 = arith.constant 1.000000e+00 : f32
    %24 = vector.broadcast %cst_15 : f32 to vector<32x16xf32>
    %25 = arith.addf %24, %23 : vector<32x16xf32>
    %26 = arith.mulf %20, %25 : vector<32x16xf32>
    %c0_16 = arith.constant 0 : index
    %c0_17 = arith.constant 0 : index
    %27 = vector.load %arg6[%c0_16, %c0_17] : memref<16x16xf32, #tpu.memory_space<vmem>>, vector<16x16xf32>
    %28 = tpu.concatenate %27, %27 in 0 : vector<16x16xf32>, vector<16x16xf32> -> vector<32x16xf32>
    %29 = arith.addf %26, %28 : vector<32x16xf32>
    %c0_18 = arith.constant 0 : index
    %c0_19 = arith.constant 0 : index
    %30 = vector.load %arg7[%c0_18, %c0_19] : memref<16x16xf32, #tpu.memory_space<vmem>>, vector<16x16xf32>
    %cst_20 = arith.constant dense<0.000000e+00> : vector<32x16xf32>
    %31 = tpu.matmul %29, %30, %cst_20 {dimension_numbers = #tpu.dot_dimension_numbers<[1], [0], [0], [1], [0, 0, 1, 1], [], []>} : vector<32x16xf32>, vector<16x16xf32>, vector<32x16xf32> -> vector<32x16xf32>
    %c0_21 = arith.constant 0 : index
    %c0_22 = arith.constant 0 : index
    %32 = vector.load %arg8[%c0_21, %c0_22] : memref<16x16xf32, #tpu.memory_space<vmem>>, vector<16x16xf32>
    %cst_23 = arith.constant dense<0.000000e+00> : vector<32x16xf32>
    %33 = tpu.matmul %29, %32, %cst_23 {dimension_numbers = #tpu.dot_dimension_numbers<[1], [0], [0], [1], [0, 0, 1, 1], [], []>} : vector<32x16xf32>, vector<16x16xf32>, vector<32x16xf32> -> vector<32x16xf32>
    %c0_24 = arith.constant 0 : index
    %c0_25 = arith.constant 0 : index
    %34 = vector.load %arg9[%c0_24, %c0_25] : memref<16x16xf32, #tpu.memory_space<vmem>>, vector<16x16xf32>
    %cst_26 = arith.constant dense<0.000000e+00> : vector<32x16xf32>
    %35 = tpu.matmul %29, %34, %cst_26 {dimension_numbers = #tpu.dot_dimension_numbers<[1], [0], [0], [1], [0, 0, 1, 1], [], []>} : vector<32x16xf32>, vector<16x16xf32>, vector<32x16xf32> -> vector<32x16xf32>
    %c0_27 = arith.constant 0 : index
    %c0_28 = arith.constant 0 : index
    %36 = vector.load %arg10[%c0_27, %c0_28] : memref<16x128xf32, #tpu.memory_space<vmem>>, vector<16x128xf32>
    %c0_29 = arith.constant 0 : index
    %c0_30 = arith.constant 0 : index
    %37 = vector.load %arg11[%c0_29, %c0_30] : memref<128x16xf32, #tpu.memory_space<vmem>>, vector<128x16xf32>
    %c0_31 = arith.constant 0 : index
    %c0_32 = arith.constant 0 : index
    %38 = vector.load %arg12[%c0_31, %c0_32] : memref<128x128xf32, #tpu.memory_space<vmem>>, vector<128x128xf32>
    %c0_33 = arith.constant 0 : index
    %c0_34 = arith.constant 0 : index
    %39 = vector.load %arg13[%c0_33, %c0_34] : memref<16x128xf32, #tpu.memory_space<vmem>>, vector<16x128xf32>
    %40 = vector.extract_strided_slice %31 {offsets = [0, 0], sizes = [16, 16], strides = [1, 1]} : vector<32x16xf32> to vector<16x16xf32>
    %41 = vector.extract_strided_slice %33 {offsets = [0, 0], sizes = [16, 16], strides = [1, 1]} : vector<32x16xf32> to vector<16x16xf32>
    %42 = vector.extract_strided_slice %35 {offsets = [0, 0], sizes = [16, 16], strides = [1, 1]} : vector<32x16xf32> to vector<16x16xf32>
    %43 = tpu.transpose %41, [1, 0] : vector<16x16xf32> -> vector<16x16xf32>
    %44 = tpu.concatenate %43, %43, %43, %43, %43, %43, %43, %43 in 1 : vector<16x16xf32>, vector<16x16xf32>, vector<16x16xf32>, vector<16x16xf32>, vector<16x16xf32>, vector<16x16xf32>, vector<16x16xf32>, vector<16x16xf32> -> vector<16x128xf32>
    %45 = arith.mulf %44, %36 : vector<16x128xf32>
    %cst_35 = arith.constant dense<0.000000e+00> : vector<16x128xf32>
    %46 = tpu.matmul %40, %45, %cst_35 {dimension_numbers = #tpu.dot_dimension_numbers<[1], [0], [0], [1], [0, 0, 1, 1], [], []>} : vector<16x16xf32>, vector<16x128xf32>, vector<16x128xf32> -> vector<16x128xf32>
    %cst_36 = arith.constant 2.500000e-01 : f32
    %47 = vector.broadcast %cst_36 : f32 to vector<16x128xf32>
    %48 = arith.mulf %46, %47 : vector<16x128xf32>
    %cst_37 = arith.constant dense<0xFF800000> : vector<16xf32>
    %49 = vector.multi_reduction <maximumf>, %48, %cst_37 [1] : vector<16x128xf32> to vector<16xf32>
    %50 = vector.shape_cast %49 : vector<16xf32> to vector<16x1xf32>
    %51 = vector.broadcast %50 : vector<16x1xf32> to vector<16x128xf32>
    %52 = arith.subf %48, %51 : vector<16x128xf32>
    %53 = math.exp %52 : vector<16x128xf32>
    %cst_38 = arith.constant dense<0.000000e+00> : vector<16x128xf32>
    %54 = tpu.matmul %53, %38, %cst_38 {dimension_numbers = #tpu.dot_dimension_numbers<[1], [0], [0], [1], [0, 0, 1, 1], [], []>} : vector<16x128xf32>, vector<128x128xf32>, vector<16x128xf32> -> vector<16x128xf32>
    %55 = tpu.reciprocal %54 {approx = true} : vector<16x128xf32> -> vector<16x128xf32>
    %56 = arith.mulf %53, %55 : vector<16x128xf32>
    %57 = arith.addf %56, %39 : vector<16x128xf32>
    %58 = tpu.concatenate %42, %42, %42, %42, %42, %42, %42, %42 in 0 : vector<16x16xf32>, vector<16x16xf32>, vector<16x16xf32>, vector<16x16xf32>, vector<16x16xf32>, vector<16x16xf32>, vector<16x16xf32>, vector<16x16xf32> -> vector<128x16xf32>
    %59 = arith.mulf %58, %37 : vector<128x16xf32>
    %cst_39 = arith.constant dense<0.000000e+00> : vector<16x16xf32>
    %60 = tpu.matmul %57, %59, %cst_39 {dimension_numbers = #tpu.dot_dimension_numbers<[1], [0], [0], [1], [0, 0, 1, 1], [], []>} : vector<16x128xf32>, vector<128x16xf32>, vector<16x16xf32> -> vector<16x16xf32>
    %61 = vector.extract_strided_slice %31 {offsets = [16, 0], sizes = [16, 16], strides = [1, 1]} : vector<32x16xf32> to vector<16x16xf32>
    %62 = vector.extract_strided_slice %33 {offsets = [16, 0], sizes = [16, 16], strides = [1, 1]} : vector<32x16xf32> to vector<16x16xf32>
    %63 = vector.extract_strided_slice %35 {offsets = [16, 0], sizes = [16, 16], strides = [1, 1]} : vector<32x16xf32> to vector<16x16xf32>
    %64 = tpu.transpose %62, [1, 0] : vector<16x16xf32> -> vector<16x16xf32>
    %65 = tpu.concatenate %64, %64, %64, %64, %64, %64, %64, %64 in 1 : vector<16x16xf32>, vector<16x16xf32>, vector<16x16xf32>, vector<16x16xf32>, vector<16x16xf32>, vector<16x16xf32>, vector<16x16xf32>, vector<16x16xf32> -> vector<16x128xf32>
    %66 = arith.mulf %65, %36 : vector<16x128xf32>
    %cst_40 = arith.constant dense<0.000000e+00> : vector<16x128xf32>
    %67 = tpu.matmul %61, %66, %cst_40 {dimension_numbers = #tpu.dot_dimension_numbers<[1], [0], [0], [1], [0, 0, 1, 1], [], []>} : vector<16x16xf32>, vector<16x128xf32>, vector<16x128xf32> -> vector<16x128xf32>
    %cst_41 = arith.constant 2.500000e-01 : f32
    %68 = vector.broadcast %cst_41 : f32 to vector<16x128xf32>
    %69 = arith.mulf %67, %68 : vector<16x128xf32>
    %cst_42 = arith.constant dense<0xFF800000> : vector<16xf32>
    %70 = vector.multi_reduction <maximumf>, %69, %cst_42 [1] : vector<16x128xf32> to vector<16xf32>
    %71 = vector.shape_cast %70 : vector<16xf32> to vector<16x1xf32>
    %72 = vector.broadcast %71 : vector<16x1xf32> to vector<16x128xf32>
    %73 = arith.subf %69, %72 : vector<16x128xf32>
    %74 = math.exp %73 : vector<16x128xf32>
    %cst_43 = arith.constant dense<0.000000e+00> : vector<16x128xf32>
    %75 = tpu.matmul %74, %38, %cst_43 {dimension_numbers = #tpu.dot_dimension_numbers<[1], [0], [0], [1], [0, 0, 1, 1], [], []>} : vector<16x128xf32>, vector<128x128xf32>, vector<16x128xf32> -> vector<16x128xf32>
    %76 = tpu.reciprocal %75 {approx = true} : vector<16x128xf32> -> vector<16x128xf32>
    %77 = arith.mulf %74, %76 : vector<16x128xf32>
    %78 = arith.addf %77, %39 : vector<16x128xf32>
    %79 = tpu.concatenate %63, %63, %63, %63, %63, %63, %63, %63 in 0 : vector<16x16xf32>, vector<16x16xf32>, vector<16x16xf32>, vector<16x16xf32>, vector<16x16xf32>, vector<16x16xf32>, vector<16x16xf32>, vector<16x16xf32> -> vector<128x16xf32>
    %80 = arith.mulf %79, %37 : vector<128x16xf32>
    %cst_44 = arith.constant dense<0.000000e+00> : vector<16x16xf32>
    %81 = tpu.matmul %78, %80, %cst_44 {dimension_numbers = #tpu.dot_dimension_numbers<[1], [0], [0], [1], [0, 0, 1, 1], [], []>} : vector<16x128xf32>, vector<128x16xf32>, vector<16x16xf32> -> vector<16x16xf32>
    %82 = tpu.concatenate %60, %81 in 0 : vector<16x16xf32>, vector<16x16xf32> -> vector<32x16xf32>
    %c0_45 = arith.constant 0 : index
    %c0_46 = arith.constant 0 : index
    %83 = vector.load %arg14[%c0_45, %c0_46] : memref<1x16xf32, #tpu.memory_space<vmem>>, vector<1x16xf32>
    %c0_47 = arith.constant 0 : index
    %c0_48 = arith.constant 0 : index
    %84 = vector.load %arg15[%c0_47, %c0_48] : memref<1x16xf32, #tpu.memory_space<vmem>>, vector<1x16xf32>
    %cst_49 = arith.constant dense<0.000000e+00> : vector<32xf32>
    %85 = vector.multi_reduction <add>, %82, %cst_49 [1] : vector<32x16xf32> to vector<32xf32>
    %86 = vector.shape_cast %85 : vector<32xf32> to vector<32x1xf32>
    %cst_50 = arith.constant 1.600000e+01 : f32
    %87 = vector.broadcast %cst_50 : f32 to vector<32x1xf32>
    %88 = arith.divf %86, %87 : vector<32x1xf32>
    %89 = vector.broadcast %88 : vector<32x1xf32> to vector<32x16xf32>
    %90 = arith.subf %82, %89 : vector<32x16xf32>
    %91 = arith.mulf %90, %90 : vector<32x16xf32>
    %cst_51 = arith.constant dense<0.000000e+00> : vector<32xf32>
    %92 = vector.multi_reduction <add>, %91, %cst_51 [1] : vector<32x16xf32> to vector<32xf32>
    %93 = vector.shape_cast %92 : vector<32xf32> to vector<32x1xf32>
    %cst_52 = arith.constant 1.600000e+01 : f32
    %94 = vector.broadcast %cst_52 : f32 to vector<32x1xf32>
    %95 = arith.divf %93, %94 : vector<32x1xf32>
    %96 = vector.broadcast %88 : vector<32x1xf32> to vector<32x16xf32>
    %97 = arith.subf %82, %96 : vector<32x16xf32>
    %cst_53 = arith.constant 9.99999974E-6 : f32
    %98 = vector.broadcast %cst_53 : f32 to vector<32x1xf32>
    %99 = arith.addf %95, %98 : vector<32x1xf32>
    %100 = math.rsqrt %99 : vector<32x1xf32>
    %101 = vector.broadcast %100 : vector<32x1xf32> to vector<32x16xf32>
    %102 = arith.mulf %97, %101 : vector<32x16xf32>
    %103 = vector.broadcast %83 : vector<1x16xf32> to vector<32x16xf32>
    %104 = arith.mulf %102, %103 : vector<32x16xf32>
    %105 = vector.broadcast %84 : vector<1x16xf32> to vector<32x16xf32>
    %106 = arith.addf %104, %105 : vector<32x16xf32>
    %107 = arith.addf %29, %106 : vector<32x16xf32>
    %c0_54 = arith.constant 0 : index
    %c0_55 = arith.constant 0 : index
    %108 = vector.load %arg16[%c0_54, %c0_55] : memref<1x16xf32, #tpu.memory_space<vmem>>, vector<1x16xf32>
    %c0_56 = arith.constant 0 : index
    %c0_57 = arith.constant 0 : index
    %109 = vector.load %arg17[%c0_56, %c0_57] : memref<1x16xf32, #tpu.memory_space<vmem>>, vector<1x16xf32>
    %cst_58 = arith.constant dense<0.000000e+00> : vector<32xf32>
    %110 = vector.multi_reduction <add>, %107, %cst_58 [1] : vector<32x16xf32> to vector<32xf32>
    %111 = vector.shape_cast %110 : vector<32xf32> to vector<32x1xf32>
    %cst_59 = arith.constant 1.600000e+01 : f32
    %112 = vector.broadcast %cst_59 : f32 to vector<32x1xf32>
    %113 = arith.divf %111, %112 : vector<32x1xf32>
    %114 = vector.broadcast %113 : vector<32x1xf32> to vector<32x16xf32>
    %115 = arith.subf %107, %114 : vector<32x16xf32>
    %116 = arith.mulf %115, %115 : vector<32x16xf32>
    %cst_60 = arith.constant dense<0.000000e+00> : vector<32xf32>
    %117 = vector.multi_reduction <add>, %116, %cst_60 [1] : vector<32x16xf32> to vector<32xf32>
    %118 = vector.shape_cast %117 : vector<32xf32> to vector<32x1xf32>
    %cst_61 = arith.constant 1.600000e+01 : f32
    %119 = vector.broadcast %cst_61 : f32 to vector<32x1xf32>
    %120 = arith.divf %118, %119 : vector<32x1xf32>
    %121 = vector.broadcast %113 : vector<32x1xf32> to vector<32x16xf32>
    %122 = arith.subf %107, %121 : vector<32x16xf32>
    %cst_62 = arith.constant 9.99999974E-6 : f32
    %123 = vector.broadcast %cst_62 : f32 to vector<32x1xf32>
    %124 = arith.addf %120, %123 : vector<32x1xf32>
    %125 = math.rsqrt %124 : vector<32x1xf32>
    %126 = vector.broadcast %125 : vector<32x1xf32> to vector<32x16xf32>
    %127 = arith.mulf %122, %126 : vector<32x16xf32>
    %128 = vector.broadcast %108 : vector<1x16xf32> to vector<32x16xf32>
    %129 = arith.mulf %127, %128 : vector<32x16xf32>
    %130 = vector.broadcast %109 : vector<1x16xf32> to vector<32x16xf32>
    %131 = arith.addf %129, %130 : vector<32x16xf32>
    %c0_63 = arith.constant 0 : index
    %c0_64 = arith.constant 0 : index
    %132 = vector.load %arg18[%c0_63, %c0_64] : memref<16x64xf32, #tpu.memory_space<vmem>>, vector<16x64xf32>
    %cst_65 = arith.constant dense<0.000000e+00> : vector<32x64xf32>
    %133 = tpu.matmul %131, %132, %cst_65 {dimension_numbers = #tpu.dot_dimension_numbers<[1], [0], [0], [1], [0, 0, 1, 1], [], []>} : vector<32x16xf32>, vector<16x64xf32>, vector<32x64xf32> -> vector<32x64xf32>
    %c0_66 = arith.constant 0 : index
    %c0_67 = arith.constant 0 : index
    %134 = vector.load %arg19[%c0_66, %c0_67] : memref<1x64xf32, #tpu.memory_space<vmem>>, vector<1x64xf32>
    %135 = vector.broadcast %134 : vector<1x64xf32> to vector<32x64xf32>
    %136 = arith.addf %133, %135 : vector<32x64xf32>
    %cst_68 = arith.constant 0.000000e+00 : f32
    %137 = vector.broadcast %cst_68 : f32 to vector<32x64xf32>
    %138 = arith.maximumf %136, %137 : vector<32x64xf32>
    %c0_69 = arith.constant 0 : index
    %c0_70 = arith.constant 0 : index
    %139 = vector.load %arg20[%c0_69, %c0_70] : memref<64x16xf32, #tpu.memory_space<vmem>>, vector<64x16xf32>
    %cst_71 = arith.constant dense<0.000000e+00> : vector<32x16xf32>
    %140 = tpu.matmul %138, %139, %cst_71 {dimension_numbers = #tpu.dot_dimension_numbers<[1], [0], [0], [1], [0, 0, 1, 1], [], []>} : vector<32x64xf32>, vector<64x16xf32>, vector<32x16xf32> -> vector<32x16xf32>
    %c0_72 = arith.constant 0 : index
    %c0_73 = arith.constant 0 : index
    %141 = vector.load %arg21[%c0_72, %c0_73] : memref<1x16xf32, #tpu.memory_space<vmem>>, vector<1x16xf32>
    %142 = vector.broadcast %141 : vector<1x16xf32> to vector<32x16xf32>
    %143 = arith.addf %140, %142 : vector<32x16xf32>
    %144 = arith.addf %131, %143 : vector<32x16xf32>
    %c0_74 = arith.constant 0 : index
    %c0_75 = arith.constant 0 : index
    %145 = vector.load %arg22[%c0_74, %c0_75] : memref<1x16xf32, #tpu.memory_space<vmem>>, vector<1x16xf32>
    %c0_76 = arith.constant 0 : index
    %c0_77 = arith.constant 0 : index
    %146 = vector.load %arg23[%c0_76, %c0_77] : memref<1x16xf32, #tpu.memory_space<vmem>>, vector<1x16xf32>
    %cst_78 = arith.constant dense<0.000000e+00> : vector<32xf32>
    %147 = vector.multi_reduction <add>, %144, %cst_78 [1] : vector<32x16xf32> to vector<32xf32>
    %148 = vector.shape_cast %147 : vector<32xf32> to vector<32x1xf32>
    %cst_79 = arith.constant 1.600000e+01 : f32
    %149 = vector.broadcast %cst_79 : f32 to vector<32x1xf32>
    %150 = arith.divf %148, %149 : vector<32x1xf32>
    %151 = vector.broadcast %150 : vector<32x1xf32> to vector<32x16xf32>
    %152 = arith.subf %144, %151 : vector<32x16xf32>
    %153 = arith.mulf %152, %152 : vector<32x16xf32>
    %cst_80 = arith.constant dense<0.000000e+00> : vector<32xf32>
    %154 = vector.multi_reduction <add>, %153, %cst_80 [1] : vector<32x16xf32> to vector<32xf32>
    %155 = vector.shape_cast %154 : vector<32xf32> to vector<32x1xf32>
    %cst_81 = arith.constant 1.600000e+01 : f32
    %156 = vector.broadcast %cst_81 : f32 to vector<32x1xf32>
    %157 = arith.divf %155, %156 : vector<32x1xf32>
    %158 = vector.broadcast %150 : vector<32x1xf32> to vector<32x16xf32>
    %159 = arith.subf %144, %158 : vector<32x16xf32>
    %cst_82 = arith.constant 9.99999974E-6 : f32
    %160 = vector.broadcast %cst_82 : f32 to vector<32x1xf32>
    %161 = arith.addf %157, %160 : vector<32x1xf32>
    %162 = math.rsqrt %161 : vector<32x1xf32>
    %163 = vector.broadcast %162 : vector<32x1xf32> to vector<32x16xf32>
    %164 = arith.mulf %159, %163 : vector<32x16xf32>
    %165 = vector.broadcast %145 : vector<1x16xf32> to vector<32x16xf32>
    %166 = arith.mulf %164, %165 : vector<32x16xf32>
    %167 = vector.broadcast %146 : vector<1x16xf32> to vector<32x16xf32>
    %168 = arith.addf %166, %167 : vector<32x16xf32>
    %c0_83 = arith.constant 0 : index
    %c0_84 = arith.constant 0 : index
    %169 = vector.load %arg24[%c0_83, %c0_84] : memref<32x16xf32, #tpu.memory_space<vmem>>, vector<32x16xf32>
    tpu.vector_store %arg24[%c0_83, %c0_84], %168 {strides = array<i32>} : memref<32x16xf32, #tpu.memory_space<vmem>>, vector<32x16xf32>,
    return
  }
  func.func @transform_0(%arg0: i32) -> (i32, i32) {
    %c0_i32 = arith.constant 0 : i32
    %c0_i32_0 = arith.constant 0 : i32
    %c0_i32_1 = arith.constant 0 : i32
    return %c0_i32, %c0_i32_0 : i32, i32
  }
  func.func @transform_1(%arg0: i32) -> (i32, i32) {
    %c0_i32 = arith.constant 0 : i32
    %c0_i32_0 = arith.constant 0 : i32
    %c0_i32_1 = arith.constant 0 : i32
    return %c0_i32, %c0_i32_0 : i32, i32
  }
  func.func @transform_2(%arg0: i32) -> (i32, i32) {
    %c0_i32 = arith.constant 0 : i32
    %c0_i32_0 = arith.constant 0 : i32
    %c0_i32_1 = arith.constant 0 : i32
    return %c0_i32, %c0_i32_0 : i32, i32
  }
  func.func @transform_3(%arg0: i32) -> (i32, i32) {
    %c0_i32 = arith.constant 0 : i32
    %c0_i32_0 = arith.constant 0 : i32
    %c0_i32_1 = arith.constant 0 : i32
    return %c0_i32, %c0_i32_0 : i32, i32
  }
  func.func @transform_4(%arg0: i32) -> (i32, i32) {
    %c0_i32 = arith.constant 0 : i32
    %c0_i32_0 = arith.constant 0 : i32
    %c0_i32_1 = arith.constant 0 : i32
    return %c0_i32, %c0_i32_0 : i32, i32
  }
  func.func @transform_5(%arg0: i32) -> (i32, i32) {
    %c0_i32 = arith.constant 0 : i32
    %c0_i32_0 = arith.constant 0 : i32
    %c0_i32_1 = arith.constant 0 : i32
    return %c0_i32, %c0_i32_0 : i32, i32
  }
  func.func @transform_6(%arg0: i32) -> (i32, i32) {
    %c0_i32 = arith.constant 0 : i32
    %c0_i32_0 = arith.constant 0 : i32
    %c0_i32_1 = arith.constant 0 : i32
    return %c0_i32, %c0_i32_0 : i32, i32
  }
  func.func @transform_7(%arg0: i32) -> (i32, i32) {
    %c0_i32 = arith.constant 0 : i32
    %c0_i32_0 = arith.constant 0 : i32
    %c0_i32_1 = arith.constant 0 : i32
    return %c0_i32, %c0_i32_0 : i32, i32
  }
  func.func @transform_8(%arg0: i32) -> (i32, i32) {
    %c0_i32 = arith.constant 0 : i32
    %c0_i32_0 = arith.constant 0 : i32
    %c0_i32_1 = arith.constant 0 : i32
    return %c0_i32, %c0_i32_0 : i32, i32
  }
  func.func @transform_9(%arg0: i32) -> (i32, i32) {
    %c0_i32 = arith.constant 0 : i32
    %c0_i32_0 = arith.constant 0 : i32
    %c0_i32_1 = arith.constant 0 : i32
    return %c0_i32, %c0_i32_0 : i32, i32
  }
  func.func @transform_10(%arg0: i32) -> (i32, i32) {
    %c0_i32 = arith.constant 0 : i32
    %c0_i32_0 = arith.constant 0 : i32
    %c0_i32_1 = arith.constant 0 : i32
    return %c0_i32, %c0_i32_0 : i32, i32
  }
  func.func @transform_11(%arg0: i32) -> (i32, i32) {
    %c0_i32 = arith.constant 0 : i32
    %c0_i32_0 = arith.constant 0 : i32
    %c0_i32_1 = arith.constant 0 : i32
    return %c0_i32, %c0_i32_0 : i32, i32
  }
  func.func @transform_12(%arg0: i32) -> (i32, i32) {
    %c0_i32 = arith.constant 0 : i32
    %c0_i32_0 = arith.constant 0 : i32
    %c0_i32_1 = arith.constant 0 : i32
    return %c0_i32, %c0_i32_0 : i32, i32
  }
  func.func @transform_13(%arg0: i32) -> (i32, i32) {
    %c0_i32 = arith.constant 0 : i32
    %c0_i32_0 = arith.constant 0 : i32
    %c0_i32_1 = arith.constant 0 : i32
    return %c0_i32, %c0_i32_0 : i32, i32
  }
  func.func @transform_14(%arg0: i32) -> (i32, i32) {
    %c0_i32 = arith.constant 0 : i32
    %c0_i32_0 = arith.constant 0 : i32
    %c0_i32_1 = arith.constant 0 : i32
    return %c0_i32, %c0_i32_0 : i32, i32
  }
  func.func @transform_15(%arg0: i32) -> (i32, i32) {
    %c0_i32 = arith.constant 0 : i32
    %c0_i32_0 = arith.constant 0 : i32
    %c0_i32_1 = arith.constant 0 : i32
    return %c0_i32, %c0_i32_0 : i32, i32
  }
  func.func @transform_16(%arg0: i32) -> (i32, i32) {
    %c0_i32 = arith.constant 0 : i32
    %c0_i32_0 = arith.constant 0 : i32
    %c0_i32_1 = arith.constant 0 : i32
    return %c0_i32, %c0_i32_0 : i32, i32
  }
  func.func @transform_17(%arg0: i32) -> (i32, i32) {
    %c0_i32 = arith.constant 0 : i32
    %c0_i32_0 = arith.constant 0 : i32
    %c0_i32_1 = arith.constant 0 : i32
    return %c0_i32, %c0_i32_0 : i32, i32
  }
  func.func @transform_18(%arg0: i32) -> (i32, i32) {
    %c0_i32 = arith.constant 0 : i32
    %c0_i32_0 = arith.constant 0 : i32
    %c0_i32_1 = arith.constant 0 : i32
    return %c0_i32, %c0_i32_0 : i32, i32
  }
  func.func @transform_19(%arg0: i32) -> (i32, i32) {
    %c0_i32 = arith.constant 0 : i32
    %c0_i32_0 = arith.constant 0 : i32
    %c0_i32_1 = arith.constant 0 : i32
    return %c0_i32, %c0_i32_0 : i32, i32
  }
  func.func @transform_20(%arg0: i32) -> (i32, i32) {
    %c0_i32 = arith.constant 0 : i32
    %c0_i32_0 = arith.constant 0 : i32
    %c0_i32_1 = arith.constant 0 : i32
    return %c0_i32, %c0_i32_0 : i32, i32
  }
  func.func @transform_21(%arg0: i32) -> (i32, i32) {
    %c0_i32 = arith.constant 0 : i32
    %c0_i32_0 = arith.constant 0 : i32
    %c0_i32_1 = arith.constant 0 : i32
    return %c0_i32, %c0_i32_0 : i32, i32
  }
  func.func @transform_22(%arg0: i32) -> (i32, i32) {
    %c0_i32 = arith.constant 0 : i32
    %c0_i32_0 = arith.constant 0 : i32
    %c0_i32_1 = arith.constant 0 : i32
    return %c0_i32, %c0_i32_0 : i32, i32
  }
  func.func @transform_23(%arg0: i32) -> (i32, i32) {
    %c0_i32 = arith.constant 0 : i32
    %c0_i32_0 = arith.constant 0 : i32
    %c0_i32_1 = arith.constant 0 : i32
    return %c0_i32, %c0_i32_0 : i32, i32
  }
}

</mosaic_0001>

<bundles_post_ra>
// kernel: tpu_custom_call.1
= control target key start
LH: loop header
LB: loop body
LE: loop exit
PB: predicated region body
PF: predicated region fallthrough
CT: control target
= control target key end

     0   :  { %vm92_vm0 = vcmask 261120   ;;  %s1929_s25 = smov 112   ;;  %s3170_s1 = inlined_call_operand.vmem [shape: f32[32,256], index: 1, kind: input, shape index: {}]   ;;  %s3171_s0 = inlined_call_operand.vmem [shape: f32[32,32], index: 0, kind: input, shape index: {}]   ;;  %s3172_s4 = inlined_call_operand.vmem [shape: f32[1,16], index: 4, kind: input, shape index: {}]   ;;  %s3173_s2 = inlined_call_operand.vmem [shape: f32[1,256], index: 2, kind: input, shape index: {}]   ;;  %s3174_s3 = inlined_call_operand.vmem [shape: f32[256,16], index: 3, kind: input, shape index: {}]   ;;  %s3175_s7 = inlined_call_operand.vmem [shape: f32[16,16], index: 7, kind: input, shape index: {}]   ;;  %s3176_s6 = inlined_call_operand.vmem [shape: f32[16,16], index: 6, kind: input, shape index: {}]   ;;  %s3177_s8 = inlined_call_operand.vmem [shape: f32[16,16], index: 8, kind: input, shape index: {}]   ;;  %s3178_s5 = inlined_call_operand.vmem [shape: f32[16,16], index: 5, kind: input, shape index: {}]   ;;  %s3179_s11 = inlined_call_operand.vmem [shape: f32[128,128], index: 11, kind: input, shape index: {}]   ;;  %s3180_s10 = inlined_call_operand.vmem [shape: f32[128,16], index: 10, kind: input, shape index: {}]   ;;  %s3181_s9 = inlined_call_operand.vmem [shape: f32[16,128], index: 9, kind: input, shape index: {}]   ;;  %s3182_s12 = inlined_call_operand.vmem [shape: f32[16,128], index: 12, kind: input, shape index: {}]   ;;  %s3183_s13 = inlined_call_operand.vmem [shape: f32[1,16], index: 13, kind: input, shape index: {}]   ;;  %s3184_s14 = inlined_call_operand.vmem [shape: f32[1,16], index: 14, kind: input, shape index: {}]   ;;  %s3185_s15 = inlined_call_operand.vmem [shape: f32[1,16], index: 15, kind: input, shape index: {}]   ;;  %s3186_s16 = inlined_call_operand.vmem [shape: f32[1,16], index: 16, kind: input, shape index: {}]   ;;  %s3187_s18 = inlined_call_operand.vmem [shape: f32[1,64], index: 18, kind: input, shape index: {}]   ;;  %s3188_s17 = inlined_call_operand.vmem [shape: f32[16,64], index: 17, kind: input, shape index: {}]   ;;  %s3189_s19 = inlined_call_operand.vmem [shape: f32[64,16], index: 19, kind: input, shape index: {}]   ;;  %s3190_s20 = inlined_call_operand.vmem [shape: f32[1,16], index: 20, kind: input, shape index: {}]   ;;  %s3191_s21 = inlined_call_operand.vmem [shape: f32[1,16], index: 21, kind: input, shape index: {}]   ;;  %s3192_s22 = inlined_call_operand.vmem [shape: f32[1,16], index: 22, kind: input, shape index: {}]   ;;  %s3193_s23 = inlined_call_operand.vmem [shape: f32[32,16], index: 23, kind: output, shape index: {}]  }
   0x1   :  { %3200 = sst [smem:[#allocation2_spill]] %s3170_s1  ;;  %s1927_s1 = smov 80  }
   0x2   :  { %3201 = sst [smem:[#allocation3_spill]] %s3171_s0 }
   0x3   :  { %3202 = sst [smem:[#allocation4_spill]] %s3172_s4 }
   0x4   :  { %3203 = sst [smem:[#allocation5_spill]] %s3173_s2 }
   0x5   :  { %3204 = sst [smem:[#allocation6_spill]] %s3174_s3 }
   0x6   :  { %3205 = sst [smem:[#allocation7_spill]] %s3175_s7 }
   0x7   :  { %3206 = sst [smem:[#allocation8_spill]] %s3176_s6 }
   0x8   :  { %3207 = sst [smem:[#allocation9_spill]] %s3177_s8 }
   0x9   :  { %s3208_s24 = sld [smem:[#allocation2_spill]] }
   0xa   :  { %s3209_s0 = sld [smem:[#allocation3_spill]] }
   0xb   :  { %s3210_s2 = sld [smem:[#allocation5_spill]] }
   0xc   :  { %s3211_s30 = sld [smem:[#allocation6_spill]] }
   0xd   :  { %s3224_s27 = sld [smem:[#allocation4_spill]] }
   0xe   :  { %s3225_s29 = sld [smem:[#allocation7_spill]] }
   0xf   :  { %v84_v0 = vld [vmem:[%s3208_s24 + $0x30] sm:$0xff]  ;;  %v85_v1 = vld [vmem:[%s3208_s24 + $0x38] sm:$0xff]  ;;  %v82_v2 = vld [vmem:[%s3208_s24 + $0x20] sm:$0xff]  ;;  %s3226_s3 = sld [smem:[#allocation8_spill]] }
  0x10   :  { %117 = vmatpush.msra.mxu0 %v84_v0  ;;  %146 = vmatpush.msra.mxu1 %v85_v1  ;;  %v83_v3 = vld [vmem:[%s3208_s24 + $0x28] sm:$0xff]  ;;  %v80_v4 = vld [vmem:[%s3208_s24 + $0x10] sm:$0xff]  ;;  %v81_v5 = vld [vmem:[%s3208_s24 + $0x18] sm:$0xff]  ;;  %s3227_s4 = sld [smem:[#allocation9_spill]] }
  0x11   :  { %v78_v6 = vld [vmem:[%s3208_s24] sm:$0xff]  ;;  %v79_v7 = vld [vmem:[%s3208_s24 + $0x8] sm:$0xff]  ;;  %v76_v10 = vld [vmem:[%s3209_s0 + $0x10] sm:$0xff] }
  0x12   :  { %118 = vmatpush.msra.mxu0 %v82_v2  ;;  %147 = vmatpush.msra.mxu1 %v83_v3  ;;  %v74_v8 = vld [vmem:[%s3209_s0] sm:$0xff]  ;;  %v75_v9 = vld [vmem:[%s3209_s0 + $0x8] sm:$0xff]  ;;  %v77_v11 = vld [vmem:[%s3209_s0 + $0x18] sm:$0xff] }
  0x13   :  { %v86_v12 = vld [vmem:[%s3210_s2] sm:$0x3]  ;;  %v530_v13 = vld [vmem:[%s3211_s30 + $0x78] sm:$0xff]  ;;  %v529_v16 = vld [vmem:[%s3211_s30 + $0x70] sm:$0xff]  ;;  %s1925_s2 = smov 48  }
  0x14   :  { %119 = vmatpush.msra.mxu0 %v80_v4  ;;  %148 = vmatpush.msra.mxu1 %v81_v5  ;;  %v2101_v14 = vperm.slane %v86_v12, 0  ;;  %v2103_v15 = vperm.slane %v86_v12, 1  ;;  %v528_v19 = vld [vmem:[%s3211_s30 + $0x68] sm:$0xff]  ;;  %v527_v22 = vld [vmem:[%s3211_s30 + $0x60] sm:$0xff]  ;;  %v526_v25 = vld [vmem:[%s3211_s30 + $0x58] sm:$0xff] }
  0x15   :  { %551 = vmatpush.msra.mxu2 %v530_v13  ;;  %v2132_v26 = vld [vmem:[%s3211_s30 + $0xf8] sm:$0xff]  ;;  %v525_v29 = vld [vmem:[%s3211_s30 + $0x50] sm:$0xff]  ;;  %v524_v35 = vld [vmem:[%s3211_s30 + $0x48] sm:$0xff] }
  0x16   :  { %120 = vmatpush.msra.mxu0 %v78_v6  ;;  %149 = vmatpush.msra.mxu1 %v79_v7  ;;  %v2145_v30 = vld [vmem:[%s3211_s30 + $0xf0] sm:$0xff]  ;;  %v2158_v36 = vld [vmem:[%s3211_s30 + $0xe8] sm:$0xff]  ;;  %v523_v42 = vld [vmem:[%s3211_s30 + $0x40] sm:$0xff] }
  0x17   :  { %1779 = vmatmul.msk.f32.vlgmr.msra.gmra.mxu0 %vm92_vm0, %v74_v8  ;;  %1783 = vmatmul.msk.f32.vlgmr.msra.gmra.mxu1 %vm92_vm0, %v74_v8  ;;  %v2176_v43 = vld [vmem:[%s3211_s30 + $0xe0] sm:$0xff]  ;;  %v522_v51 = vld [vmem:[%s3211_s30 + $0x38] sm:$0xff]  ;;  %v521_v56 = vld [vmem:[%s3211_s30 + $0x30] sm:$0xff] }
  0x18   :  { %552 = vmatpush.msra.mxu2 %v529_v16  ;;  %1823 = vmatpush.msra.mxu3 %v2132_v26  ;;  %v2193_v52 = vld [vmem:[%s3211_s30 + $0xd8] sm:$0xff]  ;;  %v2207_v57 = vld [vmem:[%s3211_s30 + $0xd0] sm:$0xff]  ;;  %v520_v0 = vld [vmem:[%s3211_s30 + $0x28] sm:$0xff] }
  0x19   :  { %v2221_v1 = vld [vmem:[%s3211_s30 + $0xc8] sm:$0xff] }
  0x1a   :  { %553 = vmatpush.msra.mxu2 %v528_v19  ;;  %1824 = vmatpush.msra.mxu3 %v2145_v30 }
  0x1c   :  { %554 = vmatpush.msra.mxu2 %v527_v22  ;;  %1825 = vmatpush.msra.mxu3 %v2158_v36  ;;  %v518_v22 = vld [vmem:[%s3211_s30 + $0x18] sm:$0xff] }
  0x1e   :  { %555 = vmatpush.msra.mxu2 %v526_v25  ;;  %1826 = vmatpush.msra.mxu3 %v2176_v43  ;;  %v2253_v25 = vld [vmem:[%s3211_s30 + $0xb8] sm:$0xff] }
  0x1f   :  { %1780 = vmatmul.msk.f32.gmra.mxu0 %vm92_vm0, %v75_v9  ;;  %1784 = vmatmul.msk.f32.gmra.mxu1 %vm92_vm0, %v75_v9  ;;  %v519_v9 = vld [vmem:[%s3211_s30 + $0x20] sm:$0xff] }
  0x20   :  { %556 = vmatpush.msra.mxu2 %v525_v29  ;;  %1827 = vmatpush.msra.mxu3 %v2193_v52 }
  0x22   :  { %557 = vmatpush.msra.mxu2 %v524_v35  ;;  %1828 = vmatpush.msra.mxu3 %v2207_v57 }
  0x24   :  { %558 = vmatpush.msra.mxu2 %v523_v42  ;;  %1829 = vmatpush.msra.mxu3 %v2221_v1 }
  0x26   :  { %559 = vmatpush.msra.mxu2 %v522_v51 }
  0x27   :  { %1781 = vmatmul.msk.f32.gmra.mxu0 %vm92_vm0, %v76_v10  ;;  %1785 = vmatmul.msk.f32.gmra.mxu1 %vm92_vm0, %v76_v10  ;;  %v2239_v10 = vld [vmem:[%s3211_s30 + $0xc0] sm:$0xff] }
  0x28   :  { %560 = vmatpush.msra.mxu2 %v521_v56  ;;  %1830 = vmatpush.msra.mxu3 %v2239_v10  ;;  %v515_v56 = vld [vmem:[%s3211_s30] sm:$0xff] }
  0x2a   :  { %561 = vmatpush.msra.mxu2 %v520_v0  ;;  %1831 = vmatpush.msra.mxu3 %v2253_v25 }
  0x2c   :  { %562 = vmatpush.msra.mxu2 %v519_v9 }
  0x2e   :  { %563 = vmatpush.msra.mxu2 %v518_v22 }
  0x2f   :  { %1782 = vmatmul.msk.f32.gmra.mxu0 %vm92_vm0, %v77_v11  ;;  %1786 = vmatmul.msk.f32.gmra.mxu1 %vm92_vm0, %v77_v11 }
  0x94   :  { %v122_v17 = vpop.f32.mrf.mxu0  ;;  %v151_v18 = vpop.f32.mrf.mxu1 }
  0x95   :  { %v2112_v20 = vadd.f32 %v122_v17, %v2101_v14  ;;  %v2115_v21 = vadd.f32 %v151_v18, %v2103_v15 }
  0x97   :  { %v2121_v23 = vmul.f32 0.70710677, %v2112_v20  ;;  %v2124_v24 = vmul.f32 0.70710677, %v2115_v21 }
  0x99   :  { %v179_v27 = vmul.f32 %v2121_v23, %v2121_v23  ;;  %v219_v28 = vmul.f32 %v2124_v24, %v2124_v24 }
  0x9b   :  { %v2147_v31 = vmin.f32 %v179_v27, 16.0  ;;  %v2149_v32 = vmin.f32 %v219_v28, 16.0 }
  0x9c   :  { %v125_v33 = vpop.f32.mrf.mxu0  ;;  %v154_v34 = vpop.f32.mrf.mxu1 }
  0x9d   :  { %v181_v37 = vmul.f32 2.1237322e-06, %v2147_v31  ;;  %v221_v38 = vmul.f32 2.1237322e-06, %v2149_v32  ;;  %v232_v39 = vmul.f32 3.8918573e-05, %v2149_v32  ;;  %v2164_v40 = vadd.f32 %v125_v33, %v2101_v14 }
  0x9e   :  { %v2168_v41 = vadd.f32 %v154_v34, %v2103_v15  ;;  %v192_v53 = vmul.f32 3.8918573e-05, %v2147_v31  ;;  %v517_v33 = vld [vmem:[%s3211_s30 + $0x10] sm:$0xff] }
  0x9f   :  { %v182_v44 = vadd.f32 0.00028619796, %v181_v37  ;;  %v233_v45 = vadd.f32 0.001143296, %v232_v39  ;;  %v222_v46 = vadd.f32 0.00028619796, %v221_v38  ;;  %564 = vmatpush.msra.mxu2 %v517_v33 }
  0xa0   :  { %v2180_v47 = vmul.f32 0.70710677, %v2164_v40  ;;  %v2183_v48 = vmul.f32 0.70710677, %v2168_v41  ;;  %v193_v5 = vadd.f32 0.001143296, %v192_v53 }
  0xa1   :  { %v183_v49 = vmul.f32 %v182_v44, %v2147_v31  ;;  %v234_v50 = vmul.f32 %v233_v45, %v2149_v32  ;;  %v223_v59 = vmul.f32 %v222_v46, %v2149_v32  ;;  %v2267_v34 = vld [vmem:[%s3211_s30 + $0xb0] sm:$0xff]  ;;  %v516_v44 = vld [vmem:[%s3211_s30 + $0x8] sm:$0xff] }
  0xa2   :  { %v259_v54 = vmul.f32 %v2180_v47, %v2180_v47  ;;  %v299_v55 = vmul.f32 %v2183_v48, %v2183_v48  ;;  %v194_v35 = vmul.f32 %v193_v5, %v2147_v31  ;;  %1832 = vmatpush.msra.mxu3 %v2267_v34  ;;  %v2280_v45 = vld [vmem:[%s3211_s30 + $0xa8] sm:$0xff]  ;;  %565 = vmatpush.msra.mxu2 %v516_v44 }
  0xa3   :  { %v235_v58 = vadd.f32 0.014752088, %v234_v50  ;;  %v184_v2 = vadd.f32 0.0036580483, %v183_v49  ;;  %v224_v12 = vadd.f32 0.0036580483, %v223_v59 }
  0xa4   :  { %v2210_v60 = vmin.f32 %v259_v54, 16.0  ;;  %v2212_v61 = vmin.f32 %v299_v55, 16.0  ;;  %v128_v62 = vpop.f32.mrf.mxu0  ;;  %v157_v63 = vpop.f32.mrf.mxu1  ;;  %1833 = vmatpush.msra.mxu3 %v2280_v45  ;;  %v195_v59 = vadd.f32 0.014752088, %v194_v35  ;;  %566 = vmatpush.msra.mxu2 %v515_v56 }
  0xa5   :  { %v236_v3 = vmul.f32 %v235_v58, %v2149_v32  ;;  %v2225_v4 = vadd.f32 %v128_v62, %v2101_v14  ;;  %v2230_v8 = vadd.f32 %v157_v63, %v2103_v15  ;;  %v185_v17 = vmul.f32 %v184_v2, %v2147_v31  ;;  %v2294_v58 = vld [vmem:[%s3211_s30 + $0xa0] sm:$0xff] }
  0xa6   :  { %v261_v6 = vmul.f32 2.1237322e-06, %v2210_v60  ;;  %v301_v7 = vmul.f32 2.1237322e-06, %v2212_v61  ;;  %v225_v39 = vmul.f32 %v224_v12, %v2149_v32  ;;  %1834 = vmatpush.msra.mxu3 %v2294_v58  ;;  %580 = vmatpush.msrb.mxu2 %v2132_v26 }
  0xa7   :  { %v237_v11 = vadd.f32 0.112945676, %v236_v3  ;;  %v2245_v19 = vmul.f32 0.70710677, %v2225_v4  ;;  %v2258_v29 = vmul.f32 0.70710677, %v2230_v8 }
  0xa8   :  { %v262_v13 = vadd.f32 0.00028619796, %v261_v6  ;;  %v302_v16 = vadd.f32 0.00028619796, %v301_v7  ;;  %v186_v46 = vadd.f32 0.05243302, %v185_v17  ;;  %581 = vmatpush.msrb.mxu2 %v2145_v30 }
  0xa9   :  { %v238_v18 = vmul.f32 %v237_v11, %v2149_v32  ;;  %v339_v38 = vmul.f32 %v2245_v19, %v2245_v19  ;;  %v379_v50 = vmul.f32 %v2258_v29, %v2258_v29  ;;  %v226_v62 = vadd.f32 0.05243302, %v225_v39 }
  0xaa   :  { %v263_v27 = vmul.f32 %v262_v13, %v2210_v60  ;;  %v303_v28 = vmul.f32 %v302_v16, %v2212_v61  ;;  %v187_v6 = vmul.f32 %v186_v46, %v2147_v31  ;;  %v196_v11 = vmul.f32 %v195_v59, %v2147_v31  ;;  %582 = vmatpush.msrb.mxu2 %v2158_v36 }
  0xab   :  { %v239_v37 = vadd.f32 0.4994258, %v238_v18  ;;  %v2282_v49 = vmin.f32 %v339_v38, 16.0  ;;  %v2299_v2 = vmin.f32 %v379_v50, 16.0  ;;  %v272_v50 = vmul.f32 3.8918573e-05, %v2210_v60 }
  0xac   :  { %v264_v42 = vadd.f32 0.0036580483, %v263_v27  ;;  %v304_v53 = vadd.f32 0.0036580483, %v303_v28  ;;  %v131_v54 = vpop.f32.mrf.mxu0  ;;  %v160_v55 = vpop.f32.mrf.mxu1  ;;  %v188_v22 = vadd.f32 0.18741608, %v187_v6  ;;  %583 = vmatpush.msrb.mxu2 %v2176_v43 }
  0xad   :  { %v240_v51 = vmul.f32 %v239_v37, %v2149_v32  ;;  %v341_v0 = vmul.f32 2.1237322e-06, %v2282_v49  ;;  %v2302_v3 = vadd.f32 %v131_v54, %v2101_v14  ;;  %v2305_v5 = vadd.f32 %v160_v55, %v2103_v15 }
  0xae   :  { %v265_v63 = vmul.f32 %v264_v42, %v2210_v60  ;;  %v305_v9 = vmul.f32 %v304_v53, %v2212_v61  ;;  %v381_v13 = vmul.f32 2.1237322e-06, %v2299_v2  ;;  %v227_v14 = vmul.f32 %v226_v62, %v2149_v32  ;;  %584 = vmatpush.msrb.mxu2 %v2193_v52  ;;  %v2349_v52 = vld [vmem:[%s3211_s30 + $0x98] sm:$0xff]  ;;  %v2354_v62 = vld [vmem:[%s3211_s30 + $0x90] sm:$0xff] }
  0xaf   :  { %v2309_v7 = vadd.f32 1.0, %v240_v51  ;;  %v342_v12 = vadd.f32 0.00028619796, %v341_v0  ;;  %v2318_v26 = vmul.f32 0.70710677, %v2302_v3  ;;  %v189_v51 = vmul.f32 %v188_v22, %v2147_v31  ;;  %1835 = vmatpush.msra.mxu3 %v2349_v52 }
  0xb0   :  { %v266_v16 = vadd.f32 0.05243302, %v265_v63  ;;  %v382_v17 = vadd.f32 0.00028619796, %v381_v13  ;;  %v2321_v18 = vmul.f32 0.70710677, %v2305_v5  ;;  %585 = vmatpush.msrb.mxu2 %v2207_v57 }
  0xb1   :  { %v343_v15 = vmul.f32 %v342_v12, %v2282_v49  ;;  %1857 = vrcp.f32 %v2309_v7  ;;  %v306_v27 = vadd.f32 0.05243302, %v305_v9  ;;  %v197_v28 = vadd.f32 0.112945676, %v196_v11  ;;  %v2362_v57 = vld [vmem:[%s3211_s30 + $0x88] sm:$0xff]  ;;  %1836 = vmatpush.msra.mxu3 %v2354_v62 }
  0xb2   :  { %v383_v33 = vmul.f32 %v382_v17, %v2299_v2  ;;  %v419_v35 = vmul.f32 %v2318_v26, %v2318_v26  ;;  %v459_v37 = vmul.f32 %v2321_v18, %v2321_v18  ;;  %v267_v38 = vmul.f32 %v266_v16, %v2210_v60  ;;  %586 = vmatpush.msrb.mxu2 %v2221_v1 }
  0xb3   :  { %v344_v30 = vadd.f32 0.0036580483, %v343_v15  ;;  %v228_v44 = vadd.f32 0.18741608, %v227_v14  ;;  %v198_v46 = vmul.f32 %v197_v28, %v2147_v31  ;;  %v307_v53 = vmul.f32 %v306_v27, %v2212_v61  ;;  %1837 = vmatpush.msra.mxu3 %v2362_v57 }
  0xb4   :  { %v384_v39 = vadd.f32 0.0036580483, %v383_v33  ;;  %v2333_v42 = vmin.f32 %v419_v35, 16.0  ;;  %v2341_v54 = vmin.f32 %v459_v37, 16.0  ;;  %v268_v63 = vadd.f32 0.18741608, %v267_v38  ;;  %587 = vmatpush.msrb.mxu2 %v2239_v10 }
  0xb5   :  { %v345_v36 = vmul.f32 %v344_v30, %v2282_v49  ;;  %v199_v59 = vadd.f32 0.4994258, %v198_v46  ;;  %v273_v12 = vadd.f32 0.001143296, %v272_v50  ;;  %v312_v13 = vmul.f32 3.8918573e-05, %v2212_v61 }
  0xb6   :  { %v421_v43 = vmul.f32 2.1237322e-06, %v2333_v42  ;;  %v385_v0 = vmul.f32 %v384_v39, %v2299_v2  ;;  %v461_v6 = vmul.f32 2.1237322e-06, %v2341_v54  ;;  %v190_v14 = vadd.f32 1.1283791, %v189_v51  ;;  %588 = vmatpush.msrb.mxu2 %v2253_v25 }
  0xb7   :  { %v2344_v55 = vpop.eup %1857  ;;  %v346_v56 = vadd.f32 0.05243302, %v345_v36  ;;  %v200_v11 = vmul.f32 %v199_v59, %v2147_v31  ;;  %v229_v16 = vmul.f32 %v228_v44, %v2149_v32  ;;  %v308_v17 = vadd.f32 0.18741608, %v307_v53  ;;  %v2378_v31 = vld [vmem:[%s3211_s30 + $0x80] sm:$0xff] }
  0xb8   :  { %v422_v9 = vadd.f32 0.00028619796, %v421_v43  ;;  %v243_v15 = vmul.f32 %v2344_v55, %v2309_v7  ;;  %v274_v27 = vmul.f32 %v273_v12, %v2210_v60  ;;  %v313_v32 = vadd.f32 0.001143296, %v312_v13  ;;  %1838 = vmatpush.msra.mxu3 %v2378_v31  ;;  %589 = vmatpush.msrb.mxu2 %v2267_v34 }
  0xb9   :  { %v347_v22 = vmul.f32 %v346_v56, %v2282_v49  ;;  %v2373_v1 = vadd.f32 1.0, %v200_v11  ;;  %v2382_v28 = vmul.f32 0.5, %v2112_v20  ;;  %v2385_v30 = vmul.f32 0.5, %v2164_v40 }
  0xba   :  { %v386_v33 = vadd.f32 0.05243302, %v385_v0  ;;  %v462_v10 = vadd.f32 0.00028619796, %v461_v6  ;;  %v269_v35 = vmul.f32 %v268_v63, %v2210_v60  ;;  %v2391_v37 = vmul.f32 0.5, %v2168_v41  ;;  %590 = vmatpush.msrb.mxu2 %v2280_v45 }
  0xbb   :  { %v423_v38 = vmul.f32 %v422_v9, %v2333_v42  ;;  %1859 = vrcp.f32 %v2373_v1  ;;  %v2395_v20 = vadd.f32 1.1283791, %v229_v16  ;;  %v244_v36 = vsub.f32 1.0, %v243_v15 }
  0xbc   :  { %v309_v40 = vmul.f32 %v308_v17, %v2212_v61  ;;  %v2399_v39 = vmul.f32 0.5, %v2225_v4  ;;  %v2404_v25 = vmul.f32 %v190_v14, %v2121_v23  ;;  %v348_v41 = vadd.f32 0.18741608, %v347_v22  ;;  %591 = vmatpush.msrb.mxu2 %v2294_v58 }
  0xbd   :  { %v275_v44 = vadd.f32 0.014752088, %v274_v27  ;;  %v314_v46 = vmul.f32 %v313_v32, %v2212_v61  ;;  %v251_v50 = vand.u32 2147483647, %v2309_v7  ;;  %v253_v51 = vand.u32 2147483648, %v2309_v7 }
  0xbe   :  { %v387_v53 = vmul.f32 %v386_v33, %v2299_v2  ;;  %v463_v4 = vmul.f32 %v462_v10, %v2341_v54  ;;  %v2412_v43 = vadd.f32 1.1283791, %v269_v35  ;;  %v424_v34 = vadd.f32 0.0036580483, %v423_v38  ;;  %592 = vmatpush.msrb.mxu2 %v2349_v52 }
  0xbf   :  { %v276_v23 = vmul.f32 %v275_v44, %v2210_v60  ;;  %v315_v56 = vadd.f32 0.014752088, %v314_v46  ;;  %v2416_v59 = vmul.f32 %v2344_v55, %v244_v36  ;;  %v2418_v63 = vadd.f32 1.1283791, %v309_v40 }
  0xc0   :  { %v352_v0 = vmul.f32 3.8918573e-05, %v2282_v49  ;;  %v392_v6 = vmul.f32 3.8918573e-05, %v2299_v2  ;;  %v349_v45 = vmul.f32 %v348_v41, %v2282_v49  ;;  %v432_v13 = vmul.f32 3.8918573e-05, %v2333_v42  ;;  %593 = vmatpush.msrb.mxu2 %v2354_v62 }
  0xc1   :  { %v1860_v9 = vpop.eup %1859  ;;  %v277_v11 = vadd.f32 0.112945676, %v276_v23  ;;  %v316_v12 = vmul.f32 %v315_v56, %v2212_v61  ;;  %v388_v14 = vadd.f32 0.18741608, %v387_v53  ;;  %v464_v16 = vadd.f32 0.0036580483, %v463_v4 }
  0xc2   :  { %v203_v15 = vmul.f32 %v1860_v9, %v2373_v1  ;;  %v353_v17 = vadd.f32 0.001143296, %v352_v0  ;;  %v425_v22 = vmul.f32 %v424_v34, %v2333_v42  ;;  %v393_v32 = vadd.f32 0.001143296, %v392_v6  ;;  %594 = vmatpush.msrb.mxu2 %v2362_v57 }
  0xc3   :  { %v278_v27 = vmul.f32 %v277_v11, %v2210_v60  ;;  %v317_v58 = vadd.f32 0.112945676, %v316_v12  ;;  %v211_v10 = vand.u32 2147483647, %v2373_v1  ;;  %v433_v38 = vadd.f32 0.001143296, %v432_v13 }
  0xc4   :  { %v204_v33 = vsub.f32 1.0, %v203_v15  ;;  %v354_v35 = vmul.f32 %v353_v17, %v2282_v49  ;;  %v213_v36 = vand.u32 2147483648, %v2373_v1  ;;  %v394_v52 = vmul.f32 %v393_v32, %v2299_v2  ;;  %595 = vmatpush.msrb.mxu2 %v2378_v31 }
  0xc5   :  { %v279_v40 = vadd.f32 0.4994258, %v278_v27  ;;  %v318_v41 = vmul.f32 %v317_v58, %v2212_v61  ;;  %vm208_vm1 = vweird.f32 %v1860_v9  ;;  %v434_v53 = vmul.f32 %v433_v38, %v2333_v42 }
  0xc6   :  { %v205_v44 = vmul.f32 %v1860_v9, %v204_v33  ;;  %v355_v46 = vadd.f32 0.014752088, %v354_v35  ;;  %v426_v4 = vadd.f32 0.05243302, %v425_v22  ;;  %v395_v56 = vadd.f32 0.014752088, %v394_v52 }
  0xc7   :  { %v280_v34 = vmul.f32 %v279_v40, %v2210_v60  ;;  %v319_v23 = vadd.f32 0.4994258, %v318_v41  ;;  %vm207_vm2 = vweird.f32 %v2373_v1  ;;  %v435_v6 = vadd.f32 0.014752088, %v434_v53 }
  0xc8   :  { %v206_v62 = vadd.f32 %v1860_v9, %v205_v44  ;;  %v356_v0 = vmul.f32 %v355_v46, %v2282_v49  ;;  %vm209_vm3 = vmor %vm207_vm2, %vm208_vm1  ;;  %v214_v11 = vor.u32 1.1754944e-38, %v213_v36  ;;  %v396_v57 = vmul.f32 %v395_v56, %v2299_v2 }
  0xc9   :  { %v2442_v12 = vadd.f32 1.0, %v280_v34  ;;  %v320_v13 = vmul.f32 %v319_v23, %v2212_v61  ;;  %vm212_vm4 = vcmp.eq.f32.partialorder %v211_v10, 8.507059e+37  ;;  %v436_v17 = vmul.f32 %v435_v6, %v2333_v42 }
  0xca   :  { %v210_v15 = vsel %vm209_vm3, %v1860_v9, %v206_v62  ;;  %v357_v60 = vadd.f32 0.112945676, %v356_v0  ;;  %v389_v1 = vmul.f32 %v388_v14, %v2299_v2  ;;  %v427_v22 = vmul.f32 %v426_v4, %v2333_v42 }
  0xcb   :  { %v215_v27 = vsel %vm212_vm4, %v214_v11, %v210_v15  ;;  %1861 = vrcp.f32 %v2442_v12  ;;  %v350_v31 = vadd.f32 1.1283791, %v349_v45  ;;  %v2451_v32 = vadd.f32 1.0, %v320_v13 }
  0xcc   :  { %v216_v58 = vmul.f32 %v215_v27, %v2404_v25  ;;  %v358_v61 = vmul.f32 %v357_v60, %v2282_v49  ;;  %v397_v33 = vadd.f32 0.112945676, %v396_v57  ;;  %v437_v9 = vadd.f32 0.112945676, %v436_v17 }
  0xcd   :  { %v472_v10 = vmul.f32 3.8918573e-05, %v2341_v54  ;;  %v2457_v35 = vmul.f32 %v2412_v43, %v2180_v47  ;;  %v465_v14 = vmul.f32 %v464_v16, %v2341_v54  ;;  %1863 = vrcp.f32 %v2451_v32 }
  0xce   :  { %v1787_v38 = vclamps-f32 %v216_v58, 1.0  ;;  %v390_v45 = vadd.f32 1.1283791, %v389_v1  ;;  %v428_v36 = vadd.f32 0.18741608, %v427_v22  ;;  %v398_v40 = vmul.f32 %v397_v33, %v2299_v2 }
  0xcf   :  { %v359_v25 = vadd.f32 0.4994258, %v358_v61  ;;  %v2464_v41 = vadd.f32 %v2344_v55, %v2416_v59  ;;  %v2468_v52 = vmul.f32 %v2418_v63, %v2183_v48  ;;  %v438_v43 = vmul.f32 %v437_v9, %v2333_v42 }
  0xd0   :  { %v499_v47 = vadd.f32 1.0, %v1787_v38  ;;  %v2472_v44 = vmul.f32 %v350_v31, %v2245_v19  ;;  %v399_v53 = vadd.f32 0.4994258, %v398_v40  ;;  %v473_v4 = vadd.f32 0.001143296, %v472_v10 }
  0xd1   :  { %v1862_v16 = vpop.eup %1861  ;;  %v360_v46 = vmul.f32 %v359_v25, %v2282_v49  ;;  %v2475_v34 = vadd.f32 0.05243302, %v465_v14  ;;  %v439_v56 = vadd.f32 0.4994258, %v438_v43  ;;  %v2480_v48 = vmul.f32 %v390_v45, %v2258_v29 }
  0xd2   :  { %v507_v59 = vmul.f32 %v499_v47, %v2382_v28  ;;  %v283_v23 = vmul.f32 %v1862_v16, %v2442_v12  ;;  %v429_v63 = vmul.f32 %v428_v36, %v2333_v42  ;;  %v400_v19 = vmul.f32 %v399_v53, %v2299_v2 }
  0xd3   :  { %v2483_v62 = vadd.f32 1.0, %v360_v46  ;;  %v1864_v0 = vpop.eup %1863  ;;  %v291_v6 = vand.u32 2147483647, %v2442_v12  ;;  %v293_v11 = vand.u32 2147483648, %v2442_v12  ;;  %v440_v28 = vmul.f32 %v439_v56, %v2333_v42 }
  0xd4   :  { %567 = vmatmul.f32.vlgmr.msra.gmra.mxu2 %v507_v59  ;;  %v284_v49 = vsub.f32 1.0, %v283_v23  ;;  %v323_v13 = vmul.f32 %v1864_v0, %v2451_v32  ;;  %vm327_vm5 = vweird.f32 %v2451_v32  ;;  %v474_v29 = vmul.f32 %v473_v4, %v2341_v54 }
  0xd5   :  { %1865 = vrcp.f32 %v2483_v62  ;;  %vm288_vm6 = vweird.f32 %v1862_v16  ;;  %v333_v2 = vand.u32 2147483648, %v2451_v32  ;;  %v2494_v15 = vadd.f32 1.0, %v400_v19 }
  0xd6   :  { %v285_v57 = vmul.f32 %v1862_v16, %v284_v49  ;;  %vm247_vm7 = vweird.f32 %v2309_v7  ;;  %vm248_vm8 = vweird.f32 %v2344_v55  ;;  %v324_v60 = vsub.f32 1.0, %v323_v13 }
  0xd7   :  { %vm328_vm9 = vweird.f32 %v1864_v0  ;;  %v331_v42 = vand.u32 2147483647, %v2451_v32  ;;  %v2499_v17 = vadd.f32 1.0, %v440_v28  ;;  %vm287_vm10 = vweird.f32 %v2442_v12 }
  0xd8   :  { %v286_v1 = vadd.f32 %v1862_v16, %v285_v57  ;;  %v371_v22 = vand.u32 2147483647, %v2483_v62  ;;  %1867 = vrcp.f32 %v2494_v15  ;;  %vm289_vm11 = vmor %vm287_vm10, %vm288_vm6  ;;  %v294_v27 = vor.u32 1.1754944e-38, %v293_v11 }
  0xd9   :  { %v325_v31 = vmul.f32 %v1864_v0, %v324_v60  ;;  %v373_v58 = vand.u32 2147483648, %v2483_v62  ;;  %v475_v61 = vadd.f32 0.014752088, %v474_v29  ;;  %vm292_vm12 = vcmp.eq.f32.partialorder %v291_v6, 8.507059e+37  ;;  %vm2507_vm13 = vmor %vm327_vm5, %vm328_vm9 }
  0xda   :  { %v290_v33 = vsel %vm289_vm11, %v1862_v16, %v286_v1  ;;  %v334_v10 = vor.u32 1.1754944e-38, %v333_v2  ;;  %1869 = vrcp.f32 %v2499_v17  ;;  %v2512_v14 = vadd.f32 1.1283791, %v429_v63  ;;  %vm2535_vm5 = vmor %vm247_vm7, %vm248_vm8 }
  0xdb   :  { %v1866_v12 = vpop.eup %1865  ;;  %v295_v38 = vsel %vm292_vm12, %v294_v27, %v290_v33  ;;  %v326_v45 = vadd.f32 %v1864_v0, %v325_v31  ;;  %vm332_vm14 = vcmp.eq.f32.partialorder %v331_v42, 8.507059e+37  ;;  %vm367_vm15 = vweird.f32 %v2483_v62 }
  0xdc   :  { %v296_v36 = vmul.f32 %v295_v38, %v2457_v35  ;;  %v363_v25 = vmul.f32 %v1866_v12, %v2483_v62  ;;  %vm2517_vm1 = vcmp.eq.f32.partialorder %v371_v22, 8.507059e+37  ;;  %v374_v47 = vor.u32 1.1754944e-38, %v373_v58 }
  0xdd   :  { %v330_v40 = vsel %vm2507_vm13, %v1864_v0, %v326_v45  ;;  %vm407_vm2 = vweird.f32 %v2494_v15  ;;  %v476_v43 = vmul.f32 %v475_v61, %v2341_v54  ;;  %v411_v4 = vand.u32 2147483647, %v2494_v15 }
  0xde   :  { %v1868_v16 = vpop.eup %1867  ;;  %v1789_v46 = vclamps-f32 %v296_v36, 1.0  ;;  %v335_v53 = vsel %vm332_vm14, %v334_v10, %v330_v40  ;;  %v364_v35 = vsub.f32 1.0, %v363_v25  ;;  %v413_v56 = vand.u32 2147483648, %v2494_v15 }
  0xdf   :  { %v336_v59 = vmul.f32 %v335_v53, %v2468_v52  ;;  %v403_v23 = vmul.f32 %v1868_v16, %v2494_v15  ;;  %v451_v63 = vand.u32 2147483647, %v2499_v17  ;;  %vm368_vm3 = vweird.f32 %v1866_v12 }
  0xe0   :  { %v1870_v19 = vpop.eup %1869  ;;  %v501_v0 = vadd.f32 1.0, %v1789_v46  ;;  %v365_v49 = vmul.f32 %v1866_v12, %v364_v35  ;;  %v477_v6 = vadd.f32 0.112945676, %v476_v43  ;;  %vm408_vm4 = vweird.f32 %v1868_v16  ;;  %vm369_vm7 = vmor %vm367_vm15, %vm368_vm3 }
  0xe1   :  { %v1790_v11 = vclamps-f32 %v336_v59, 1.0  ;;  %v404_v28 = vsub.f32 1.0, %v403_v23  ;;  %v443_v13 = vmul.f32 %v1870_v19, %v2499_v17  ;;  %vm2541_vm6 = vcmp.eq.f32.partialorder %v251_v50, 8.507059e+37  ;;  %vm2556_vm8 = vmor %vm407_vm2, %vm408_vm4 }
  0xe2   :  { %v509_v57 = vmul.f32 %v501_v0, %v2385_v30  ;;  %v366_v2 = vadd.f32 %v1866_v12, %v365_v49  ;;  %vm2546_vm9 = vcmp.eq.f32.partialorder %v411_v4, 8.507059e+37  ;;  %v478_v42 = vmul.f32 %v477_v6, %v2341_v54 }
  0xe3   :  { %v502_v1 = vadd.f32 1.0, %v1790_v11  ;;  %v405_v22 = vmul.f32 %v1868_v16, %v404_v28  ;;  %v414_v27 = vor.u32 1.1754944e-38, %v413_v56  ;;  %v444_v31 = vsub.f32 1.0, %v443_v13 }
  0xe4   :  { %570 = vmatmul.f32.gmra.mxu2 %v509_v57  ;;  %v370_v50 = vsel %vm369_vm7, %v1866_v12, %v366_v2  ;;  %vm448_vm10 = vweird.f32 %v1870_v19  ;;  %v453_v58 = vand.u32 2147483648, %v2499_v17  ;;  %v479_v61 = vadd.f32 0.4994258, %v478_v42 }
  0xe5   :  { %v510_v33 = vmul.f32 %v502_v1, %v2391_v37  ;;  %v375_v62 = vsel %vm2517_vm1, %v374_v47, %v370_v50  ;;  %v406_v9 = vadd.f32 %v1868_v16, %v405_v22  ;;  %v445_v10 = vmul.f32 %v1870_v19, %v444_v31 }
  0xe6   :  { %v254_v12 = vor.u32 1.1754944e-38, %v253_v51  ;;  %v467_v15 = vmul.f32 %v2475_v34, %v2341_v54  ;;  %v376_v38 = vmul.f32 %v375_v62, %v2472_v44  ;;  %v480_v45 = vmul.f32 %v479_v61, %v2341_v54 }
  0xe7   :  { %v250_v37 = vsel %vm2535_vm5, %v2344_v55, %v2464_v41  ;;  %599 = vmatmul.f32.vlgmr.msra.gmra.mxu3 %v510_v33  ;;  %v410_v36 = vsel %vm2556_vm8, %v1868_v16, %v406_v9  ;;  %v446_v25 = vadd.f32 %v1870_v19, %v445_v10  ;;  %vm447_vm11 = vweird.f32 %v2499_v17 }
  0xe8   :  { %v1791_v7 = vclamps-f32 %v376_v38, 1.0  ;;  %v415_v51 = vsel %vm2546_vm9, %v414_v27, %v410_v36  ;;  %vm449_vm12 = vmor %vm447_vm11, %vm448_vm10  ;;  %v454_v44 = vor.u32 1.1754944e-38, %v453_v58  ;;  %v481_v34 = vadd.f32 1.0, %v480_v45 }
  0xe9   :  { %v431_v32 = vmul.f32 %v2512_v14, %v2318_v26  ;;  %v416_v55 = vmul.f32 %v415_v51, %v2480_v48  ;;  %v450_v41 = vsel %vm449_vm12, %v1870_v19, %v446_v25  ;;  %vm452_vm13 = vcmp.eq.f32.partialorder %v451_v63, 8.507059e+37 }
  0xea   :  { %v468_v40 = vadd.f32 0.18741608, %v467_v15  ;;  %v503_v47 = vadd.f32 1.0, %v1791_v7  ;;  %v455_v43 = vsel %vm452_vm13, %v454_v44, %v450_v41  ;;  %1871 = vrcp.f32 %v481_v34 }
  0xeb   :  { %v168_v17 = vmul.f32 0.5, %v2230_v8  ;;  %v1792_v16 = vclamps-f32 %v416_v55, 1.0  ;;  %v456_v46 = vmul.f32 %v455_v43, %v431_v32  ;;  %v255_v35 = vsel %vm2541_vm6, %v254_v12, %v250_v37 }
  0xec   :  { %v511_v53 = vmul.f32 %v503_v47, %v2399_v39  ;;  %v231_v26 = vmul.f32 %v2395_v20, %v2124_v24  ;;  %v469_v48 = vmul.f32 %v468_v40, %v2341_v54  ;;  %v169_v8 = vmul.f32 0.5, %v2302_v3 }
  0xed   :  { %v504_v4 = vadd.f32 1.0, %v1792_v16  ;;  %v1793_v59 = vclamps-f32 %v456_v46, 1.0  ;;  %v493_v49 = vand.u32 2147483648, %v481_v34  ;;  %vm487_vm14 = vweird.f32 %v481_v34 }
  0xee   :  { %573 = vmatmul.f32.gmra.mxu2 %v511_v53  ;;  %v256_v63 = vmul.f32 %v255_v35, %v231_v26  ;;  %v470_v39 = vadd.f32 1.1283791, %v469_v48  ;;  %v491_v11 = vand.u32 2147483647, %v481_v34  ;;  %v164_v29 = vmul.f32 0.5, %v2115_v21 }
  0xef   :  { %v512_v14 = vmul.f32 %v504_v4, %v168_v17  ;;  %v505_v23 = vadd.f32 1.0, %v1793_v59  ;;  %v494_v54 = vor.u32 1.1754944e-38, %v493_v49  ;;  %v170_v42 = vmul.f32 0.5, %v2305_v5 }
  0xf0   :  { %v1872_v56 = vpop.eup %1871  ;;  %v1788_v28 = vclamps-f32 %v256_v63, 1.0  ;;  %v471_v20 = vmul.f32 %v470_v39, %v2321_v18  ;;  %vm492_vm2 = vcmp.eq.f32.partialorder %v491_v11, 8.507059e+37  ;;  %v1848_v18 = vld [vmem:[%s3224_s27] ss:$0 sm:$0xff] }
  0xf1   :  { %602 = vmatmul.f32.gmra.mxu3 %v512_v14  ;;  %v483_v19 = vmul.f32 %v1872_v56, %v481_v34  ;;  %v513_v0 = vmul.f32 %v505_v23, %v169_v8  ;;  %vm488_vm15 = vweird.f32 %v1872_v56 }
  0xf2   :  { %vm489_vm1 = vmor %vm487_vm14, %vm488_vm15  ;;  %v500_v52 = vadd.f32 1.0, %v1788_v28 }
  0xf3   :  { %v484_v6 = vsub.f32 1.0, %v483_v19 }
  0xf4   :  { %v508_v60 = vmul.f32 %v500_v52, %v164_v29 }
  0xf5   :  { %v485_v24 = vmul.f32 %v1872_v56, %v484_v6 }
  0xf6   :  { %576 = vmatmul.f32.gmra.mxu2 %v513_v0 }
  0xf7   :  { %v486_v13 = vadd.f32 %v1872_v56, %v485_v24 }
  0xf9   :  { %v490_v3 = vsel %vm489_vm1, %v1872_v56, %v486_v13  ;;  %vm793_vm1 = vcmask 130048  }
  0xfa   :  { %v495_v57 = vsel %vm492_vm2, %v494_v54, %v490_v3 }
  0xfb   :  { %v496_v2 = vmul.f32 %v495_v57, %v471_v20 }
  0xfd   :  { %v1794_v1 = vclamps-f32 %v496_v2, 1.0 }
  0xfe   :  { %596 = vmatmul.f32.vlgmr.msrb.gmra.mxu2 %v508_v60 }
  0xff   :  { %v506_v22 = vadd.f32 1.0, %v1794_v1 }
 0x101   :  { %v514_v27 = vmul.f32 %v506_v22, %v170_v42 }
 0x103   :  { %605 = vmatmul.f32.gmra.mxu3 %v514_v27 }
 0x157   :  { %v568_v31 = vpop.f32.mrf.mxu2 }
 0x158   :  { %v569_v55 = vadd.f32 %v1848_v18, %v568_v31 }
 0x167   :  { %v571_v50 = vpop.f32.mrf.mxu2 }
 0x168   :  { %v572_v30 = vadd.f32 %v1848_v18, %v571_v50 }
 0x16a   :  { %v600_v58 = vpop.f32.mrf.mxu3 }
 0x16b   :  { %v2597_v61 = vadd.f32 %v600_v58, %v572_v30 }
 0x16d   :  { %v2600_v21 = vmul.f32 0.70710677, %v2597_v61 }
 0x16f   :  { %v657_v5 = vmul.f32 %v2600_v21, %v2600_v21 }
 0x171   :  { %v2604_v33 = vmin.f32 %v657_v5, 16.0  ;;  %v574_v62 = vpop.f32.mrf.mxu2 }
 0x172   :  { %v575_v9 = vadd.f32 %v1848_v18, %v574_v62 }
 0x173   :  { %v670_v10 = vmul.f32 3.8918573e-05, %v2604_v33  ;;  %v659_v35 = vmul.f32 2.1237322e-06, %v2604_v33 }
 0x174   :  { %v603_v12 = vpop.f32.mrf.mxu3 }
 0x175   :  { %v671_v15 = vadd.f32 0.001143296, %v670_v10  ;;  %v2607_v38 = vadd.f32 %v603_v12, %v575_v9  ;;  %v660_v63 = vadd.f32 0.00028619796, %v659_v35  ;;  %v792_v35 = vld [vmem:[%s3226_s3 + $0x8] sm:$0xff] }
 0x176   :  { %820 = vmatpush.msrb.mxu0 %v792_v35 }
 0x177   :  { %v672_v45 = vmul.f32 %v671_v15, %v2604_v33  ;;  %v2611_v37 = vmul.f32 0.70710677, %v2607_v38  ;;  %v661_v24 = vmul.f32 %v660_v63, %v2604_v33  ;;  %v867_v63 = vld [vmem:[%s3227_s4 + $0x8] sm:$0xff] }
 0x178   :  { %882 = vmatpush.msra.mxu2 %v867_v63 }
 0x179   :  { %v673_v36 = vadd.f32 0.014752088, %v672_v45  ;;  %v697_v25 = vmul.f32 %v2611_v37, %v2611_v37  ;;  %v577_v7 = vpop.f32.mrf.mxu2  ;;  %v662_v2 = vadd.f32 0.0036580483, %v661_v24 }
 0x17a   :  { %v578_v46 = vadd.f32 %v1848_v18, %v577_v7 }
 0x17b   :  { %v674_v51 = vmul.f32 %v673_v36, %v2604_v33  ;;  %v2616_v44 = vmin.f32 %v697_v25, 16.0  ;;  %v663_v31 = vmul.f32 %v662_v2, %v2604_v33 }
 0x17d   :  { %v675_v34 = vadd.f32 0.112945676, %v674_v51  ;;  %v710_v32 = vmul.f32 3.8918573e-05, %v2616_v44  ;;  %v699_v20 = vmul.f32 2.1237322e-06, %v2616_v44 }
 0x17e   :  { %v664_v15 = vadd.f32 0.05243302, %v663_v31 }
 0x17f   :  { %v711_v41 = vadd.f32 0.001143296, %v710_v32  ;;  %v676_v47 = vmul.f32 %v675_v34, %v2604_v33  ;;  %v700_v60 = vadd.f32 0.00028619796, %v699_v20 }
 0x181   :  { %v597_v40 = vpop.f32.mrf.mxu2  ;;  %v712_v43 = vmul.f32 %v711_v41, %v2616_v44  ;;  %v677_v4 = vadd.f32 0.4994258, %v676_v47  ;;  %v701_v30 = vmul.f32 %v700_v60, %v2616_v44  ;;  %v665_v41 = vmul.f32 %v664_v15, %v2604_v33 }
 0x182   :  { %v2621_v17 = vadd.f32 %v597_v40, %v569_v55 }
 0x183   :  { %v713_v16 = vadd.f32 0.014752088, %v712_v43  ;;  %v678_v8 = vmul.f32 %v677_v4, %v2604_v33  ;;  %v702_v7 = vadd.f32 0.0036580483, %v701_v30  ;;  %v835_v4 = vld [vmem:[%s3225_s29] sm:$0xff] }
 0x184   :  { %v2624_v53 = vmul.f32 0.70710677, %v2621_v17 }
 0x185   :  { %v714_v59 = vmul.f32 %v713_v16, %v2616_v44  ;;  %v2644_v54 = vadd.f32 1.0, %v678_v8  ;;  %v703_v16 = vmul.f32 %v702_v7, %v2616_v44  ;;  %v791_v8 = vld [vmem:[%s3226_s3] sm:$0xff]  ;;  %s1928_s3 = smov 96  }
 0x186   :  { %v606_v26 = vpop.f32.mrf.mxu3  ;;  %v617_v48 = vmul.f32 %v2624_v53, %v2624_v53  ;;  %821 = vmatpush.msrb.mxu0 %v791_v8 }
 0x187   :  { %v715_v14 = vadd.f32 0.112945676, %v714_v59  ;;  %v2630_v23 = vadd.f32 %v606_v26, %v578_v46  ;;  %1873 = vrcp.f32 %v2644_v54  ;;  %v836_v46 = vld [vmem:[%s3225_s29 + $0x8] sm:$0xff]  ;;  %v691_v2 = vand.u32 2147483648, %v2644_v54  ;;  %s1924_s29 = smov 16  }
 0x188   :  { %v2632_v56 = vmin.f32 %v617_v48, 16.0  ;;  %851 = vmatpush.msrb.mxu1 %v836_v46  ;;  %vm685_vm4 = vweird.f32 %v2644_v54 }
 0x189   :  { %v716_v19 = vmul.f32 %v715_v14, %v2616_v44  ;;  %v2637_v39 = vmul.f32 0.70710677, %v2630_v23 }
 0x18a   :  { %v619_v0 = vmul.f32 2.1237322e-06, %v2632_v56  ;;  %v630_v49 = vmul.f32 3.8918573e-05, %v2632_v56  ;;  %852 = vmatpush.msrb.mxu1 %v835_v4 }
 0x18b   :  { %v737_v6 = vmul.f32 %v2637_v39, %v2637_v39  ;;  %v717_v13 = vadd.f32 0.4994258, %v716_v19  ;;  %v866_v19 = vld [vmem:[%s3227_s4] sm:$0xff] }
 0x18c   :  { %v620_v11 = vadd.f32 0.00028619796, %v619_v0  ;;  %v631_v28 = vadd.f32 0.001143296, %v630_v49  ;;  %v666_v49 = vadd.f32 0.18741608, %v665_v41  ;;  %883 = vmatpush.msra.mxu2 %v866_v19 }
 0x18d   :  { %v2647_v52 = vmin.f32 %v737_v6, 16.0  ;;  %v718_v42 = vmul.f32 %v717_v13, %v2616_v44  ;;  %v2661_v62 = vpop.eup %1873  ;;  %v609_v19 = vmul.f32 0.5, %v2621_v17 }
 0x18e   :  { %v621_v3 = vmul.f32 %v620_v11, %v2632_v56  ;;  %v632_v29 = vmul.f32 %v631_v28, %v2632_v56  ;;  %v681_v25 = vmul.f32 %v2661_v62, %v2644_v54  ;;  %v704_v28 = vadd.f32 0.05243302, %v703_v16 }
 0x18f   :  { %v750_v57 = vmul.f32 3.8918573e-05, %v2647_v52  ;;  %v2658_v58 = vadd.f32 1.0, %v718_v42  ;;  %v739_v5 = vmul.f32 2.1237322e-06, %v2647_v52  ;;  %vm686_vm3 = vweird.f32 %v2661_v62 }
 0x190   :  { %v622_v22 = vadd.f32 0.0036580483, %v621_v3  ;;  %v633_v27 = vadd.f32 0.014752088, %v632_v29  ;;  %v682_v43 = vsub.f32 1.0, %v681_v25  ;;  %v667_v29 = vmul.f32 %v666_v49, %v2604_v33  ;;  %vm2714_vm5 = vmor %vm685_vm4, %vm686_vm3 }
 0x191   :  { %v751_v1 = vadd.f32 0.001143296, %v750_v57  ;;  %1875 = vrcp.f32 %v2658_v58  ;;  %v740_v51 = vadd.f32 0.00028619796, %v739_v5  ;;  %v705_v60 = vmul.f32 %v704_v28, %v2616_v44 }
 0x192   :  { %v634_v50 = vmul.f32 %v633_v27, %v2632_v56  ;;  %v623_v10 = vmul.f32 %v622_v22, %v2632_v56  ;;  %v683_v11 = vmul.f32 %v2661_v62, %v682_v43  ;;  %v668_v31 = vadd.f32 1.1283791, %v667_v29 }
 0x193   :  { %v752_v18 = vmul.f32 %v751_v1, %v2647_v52  ;;  %v741_v59 = vmul.f32 %v740_v51, %v2647_v52  ;;  %v692_v5 = vor.u32 1.1754944e-38, %v691_v2  ;;  %v731_v46 = vand.u32 2147483648, %v2658_v58 }
 0x194   :  { %v635_v12 = vadd.f32 0.112945676, %v634_v50  ;;  %v624_v32 = vadd.f32 0.05243302, %v623_v10  ;;  %v684_v57 = vadd.f32 %v2661_v62, %v683_v11  ;;  %v689_v50 = vand.u32 2147483647, %v2644_v54 }
 0x195   :  { %v753_v9 = vadd.f32 0.014752088, %v752_v18  ;;  %v742_v20 = vadd.f32 0.0036580483, %v741_v59  ;;  %vm725_vm12 = vweird.f32 %v2658_v58  ;;  %v729_v35 = vand.u32 2147483647, %v2658_v58 }
 0x196   :  { %v636_v36 = vmul.f32 %v635_v12, %v2632_v56  ;;  %v625_v48 = vmul.f32 %v624_v32, %v2632_v56  ;;  %v688_v30 = vsel %vm2714_vm5, %v2661_v62, %v684_v57  ;;  %v669_v62 = vmul.f32 %v668_v31, %v2600_v21 }
 0x197   :  { %v754_v45 = vmul.f32 %v753_v9, %v2647_v52  ;;  %v2695_v0 = vpop.eup %1875  ;;  %v743_v22 = vmul.f32 %v742_v20, %v2647_v52  ;;  %v706_v9 = vadd.f32 0.18741608, %v705_v60  ;;  %vm690_vm9 = vcmp.eq.f32.partialorder %v689_v50, 8.507059e+37  ;;  %v785_v20 = vld [vmem:[%s3178_s5] sm:$0xff] }
 0x198   :  { %v637_v55 = vadd.f32 0.4994258, %v636_v36  ;;  %v721_v24 = vmul.f32 %v2695_v0, %v2658_v58  ;;  %v626_v3 = vadd.f32 0.18741608, %v625_v48  ;;  %v693_v51 = vsel %vm690_vm9, %v692_v5, %v688_v30 }
 0x199   :  { %v755_v34 = vadd.f32 0.112945676, %v754_v45  ;;  %v744_v15 = vadd.f32 0.05243302, %v743_v22  ;;  %vm726_vm8 = vweird.f32 %v2695_v0  ;;  %v694_v21 = vmul.f32 %v693_v51, %v669_v62  ;;  %v921_v62 = vld [vmem:[%s3179_s11 + $0x30] sm:$0xff]  ;;  %v920_v51 = vld [vmem:[%s3179_s11 + $0x28] sm:$0xff] }
 0x19a   :  { %v638_v47 = vmul.f32 %v637_v55, %v2632_v56  ;;  %v722_v1 = vsub.f32 1.0, %v721_v24  ;;  %v627_v27 = vmul.f32 %v626_v3, %v2632_v56  ;;  %vm727_vm13 = vmor %vm725_vm12, %vm726_vm8  ;;  %v732_v8 = vor.u32 1.1754944e-38, %v731_v46 }
 0x19b   :  { %v756_v40 = vmul.f32 %v755_v34, %v2647_v52  ;;  %v707_v34 = vmul.f32 %v706_v9, %v2616_v44  ;;  %v745_v41 = vmul.f32 %v744_v15, %v2647_v52  ;;  %v1796_v63 = vclamps-f32 %v694_v21, 1.0  ;;  %v927_v15 = vld [vmem:[%s3179_s11 + $0x60] sm:$0xff]  ;;  %v914_v21 = vld [vmem:[%s3180_s10 + $0x78] sm:$0xff] }
 0x19c   :  { %v2684_v14 = vadd.f32 1.0, %v638_v47  ;;  %v723_v56 = vmul.f32 %v2695_v0, %v722_v1  ;;  %v628_v45 = vadd.f32 1.1283791, %v627_v27  ;;  %vm730_vm14 = vcmp.eq.f32.partialorder %v729_v35, 8.507059e+37 }
 0x19d   :  { %v757_v26 = vadd.f32 0.4994258, %v756_v40  ;;  %v708_v59 = vadd.f32 1.1283791, %v707_v34  ;;  %v746_v48 = vadd.f32 0.18741608, %v745_v41 }
 0x19e   :  { %1877 = vrcp.f32 %v2684_v14  ;;  %v651_v36 = vand.u32 2147483648, %v2684_v14  ;;  %v649_v54 = vand.u32 2147483647, %v2684_v14  ;;  %vm645_vm7 = vweird.f32 %v2684_v14  ;;  %v919_v34 = vld [vmem:[%s3179_s11 + $0x20] sm:$0xff]  ;;  %v916_v41 = vld [vmem:[%s3179_s11 + $0x8] sm:$0xff] }
 0x19f   :  { %v758_v6 = vmul.f32 %v757_v26, %v2647_v52  ;;  %v724_v55 = vadd.f32 %v2695_v0, %v723_v56  ;;  %v629_v43 = vmul.f32 %v628_v45, %v2624_v53  ;;  %v747_v11 = vmul.f32 %v746_v48, %v2647_v52  ;;  %v928_v56 = vld [vmem:[%s3179_s11 + $0x68] sm:$0xff]  ;;  %v926_v45 = vld [vmem:[%s3179_s11 + $0x58] sm:$0xff]  ;;  %v911_v48 = vld [vmem:[%s3180_s10 + $0x60] sm:$0xff] }
 0x1a0   :  { %v652_v40 = vor.u32 1.1754944e-38, %v651_v36  ;;  %vm650_vm11 = vcmp.eq.f32.partialorder %v649_v54, 8.507059e+37  ;;  %v778_v24 = vadd.f32 1.0, %v1796_v63  ;;  %v610_v52 = vmul.f32 0.5, %v2597_v61  ;;  %v786_v61 = vld [vmem:[%s3178_s5 + $0x8] sm:$0xff]  ;;  %v925_v36 = vld [vmem:[%s3179_s11 + $0x50] sm:$0xff] }
 0x1a1   :  { %v2702_v13 = vadd.f32 1.0, %v758_v6  ;;  %v728_v26 = vsel %vm727_vm13, %v2695_v0, %v724_v55  ;;  %v709_v6 = vmul.f32 %v708_v59, %v2611_v37  ;;  %v748_v57 = vadd.f32 1.1283791, %v747_v11  ;;  %v922_v54 = vld [vmem:[%s3179_s11 + $0x38] sm:$0xff]  ;;  %v917_v55 = vld [vmem:[%s3179_s11 + $0x10] sm:$0xff]  ;;  %v912_v59 = vld [vmem:[%s3180_s10 + $0x68] sm:$0xff] }
 0x1a2   :  { %v733_v58 = vsel %vm730_vm14, %v732_v8, %v728_v26  ;;  %v611_v18 = vmul.f32 0.5, %v2607_v38  ;;  %v612_v9 = vmul.f32 0.5, %v2630_v23  ;;  %v930_v23 = vld [vmem:[%s3179_s11 + $0x78] sm:$0xff]  ;;  %s1926_s5 = smov 64   ;;  %vm1013_vm5 = vcmask 392192  }
 0x1a3   :  { %1879 = vrcp.f32 %v2702_v13  ;;  %v771_v3 = vand.u32 2147483648, %v2702_v13  ;;  %v734_v17 = vmul.f32 %v733_v58, %v709_v6  ;;  %vm765_vm2 = vweird.f32 %v2702_v13  ;;  %1071 = vmatpush.msra.mxu0 %v930_v23  ;;  %1272 = vmatpush.msrb.mxu2 %v930_v23  ;;  %v908_v58 = vld [vmem:[%s3180_s10 + $0x48] sm:$0xff] }
 0x1a4   :  { %v1878_v42 = vpop.eup %1877  ;;  %v769_v37 = vand.u32 2147483647, %v2702_v13  ;;  %v749_v22 = vmul.f32 %v748_v57, %v2637_v39  ;;  %v904_v57 = vld [vmem:[%s3180_s10 + $0x28] sm:$0xff]  ;;  %vm1019_vm9 = vcmask 654336   ;;  %vm1025_vm8 = vcmask 916480  }
 0x1a5   :  { %v641_v33 = vmul.f32 %v1878_v42, %v2684_v14  ;;  %vm646_vm6 = vweird.f32 %v1878_v42  ;;  %v772_v60 = vor.u32 1.1754944e-38, %v771_v3 }
 0x1a6   :  { %vm647_vm10 = vmor %vm645_vm7, %vm646_vm6  ;;  %vm770_vm4 = vcmp.eq.f32.partialorder %v769_v37, 8.507059e+37  ;;  %vm1016_vm6 = vcmask 523264   ;;  %vm1022_vm7 = vcmask 785408  }
 0x1a7   :  { %v642_v10 = vsub.f32 1.0, %v641_v33 }
 0x1a9   :  { %v2722_v12 = vpop.eup %1879  ;;  %v643_v7 = vmul.f32 %v1878_v42, %v642_v10 }
 0x1aa   :  { %v761_v25 = vmul.f32 %v2722_v12, %v2702_v13  ;;  %vm766_vm15 = vweird.f32 %v2722_v12  ;;  %v1797_v13 = vclamps-f32 %v734_v17, 1.0  ;;  %v905_v17 = vld [vmem:[%s3180_s10 + $0x30] sm:$0xff] }
 0x1ab   :  { %v644_v32 = vadd.f32 %v1878_v42, %v643_v7  ;;  %vm767_vm3 = vmor %vm765_vm2, %vm766_vm15  ;;  %v923_v7 = vld [vmem:[%s3179_s11 + $0x40] sm:$0xff] }
 0x1ac   :  { %v762_v47 = vsub.f32 1.0, %v761_v25  ;;  %v779_v33 = vadd.f32 1.0, %v1797_v13  ;;  %v924_v25 = vld [vmem:[%s3179_s11 + $0x48] sm:$0xff] }
 0x1ad   :  { %v648_v16 = vsel %vm647_vm10, %v1878_v42, %v644_v32  ;;  %v782_v42 = vmul.f32 %v778_v24, %v610_v52  ;;  %v918_v32 = vld [vmem:[%s3179_s11 + $0x18] sm:$0xff] }
 0x1ae   :  { %v653_v44 = vsel %vm650_vm11, %v652_v40, %v648_v16  ;;  %v763_v53 = vmul.f32 %v2722_v12, %v762_v47  ;;  %v783_v50 = vmul.f32 %v779_v33, %v611_v18  ;;  %v915_v47 = vld [vmem:[%s3179_s11] sm:$0xff]  ;;  %v906_v24 = vld [vmem:[%s3180_s10 + $0x38] sm:$0xff] }
 0x1af   :  { %v654_v4 = vmul.f32 %v653_v44, %v629_v43  ;;  %v2768_v27 = vadd.f32 %v786_v61, %v782_v42  ;;  %v913_v44 = vld [vmem:[%s3180_s10 + $0x70] sm:$0xff]  ;;  %v903_v42 = vld [vmem:[%s3180_s10 + $0x20] sm:$0xff] }
 0x1b0   :  { %v764_v28 = vadd.f32 %v2722_v12, %v763_v53  ;;  %v2777_v5 = vadd.f32 %v785_v20, %v783_v50 }
 0x1b1   :  { %v1795_v14 = vclamps-f32 %v654_v4, 1.0 }
 0x1b2   :  { %v768_v2 = vsel %vm767_vm3, %v2722_v12, %v764_v28  ;;  %v929_v12 = vld [vmem:[%s3179_s11 + $0x70] sm:$0xff]  ;;  %v907_v28 = vld [vmem:[%s3180_s10 + $0x40] sm:$0xff] }
 0x1b3   :  { %v777_v49 = vadd.f32 1.0, %v1795_v14  ;;  %v773_v1 = vsel %vm770_vm4, %v772_v60, %v768_v2  ;;  %1072 = vmatpush.msra.mxu0 %v929_v12  ;;  %1273 = vmatpush.msrb.mxu2 %v929_v12  ;;  %v910_v14 = vld [vmem:[%s3180_s10 + $0x58] sm:$0xff] }
 0x1b4   :  { %v774_v31 = vmul.f32 %v773_v1, %v749_v22  ;;  %v902_v1 = vld [vmem:[%s3180_s10 + $0x18] sm:$0xff] }
 0x1b5   :  { %v781_v0 = vmul.f32 %v777_v49, %v609_v19  ;;  %1073 = vmatpush.msra.mxu0 %v928_v56  ;;  %1274 = vmatpush.msrb.mxu2 %v928_v56  ;;  %v909_v19 = vld [vmem:[%s3180_s10 + $0x50] sm:$0xff] }
 0x1b6   :  { %v1798_v30 = vclamps-f32 %v774_v31, 1.0  ;;  %v901_v31 = vld [vmem:[%s3180_s10 + $0x10] sm:$0xff] }
 0x1b7   :  { %v2754_v29 = vadd.f32 %v785_v20, %v781_v0  ;;  %1074 = vmatpush.msra.mxu0 %v927_v15  ;;  %1275 = vmatpush.msrb.mxu2 %v927_v15 }
 0x1b8   :  { %v780_v39 = vadd.f32 1.0, %v1798_v30  ;;  %v900_v30 = vld [vmem:[%s3180_s10 + $0x8] sm:$0xff] }
 0x1b9   :  { %1799 = vmatmul.msk.f32.vlgmr.msrb.gmra.mxu0 %vm793_vm1, %v2754_v29  ;;  %1803 = vmatmul.msk.f32.vlgmr.msrb.gmra.mxu1 %vm793_vm1, %v2754_v29 }
 0x1ba   :  { %1807 = vmatmul.msk.f32.vlgmr.msra.gmra.mxu2 %vm793_vm1, %v2754_v29  ;;  %v784_v38 = vmul.f32 %v780_v39, %v612_v9  ;;  %1075 = vmatpush.msra.mxu0 %v926_v45 }
 0x1bb   :  { %1276 = vmatpush.msrb.mxu2 %v926_v45 }
 0x1bc   :  { %v2786_v10 = vadd.f32 %v786_v61, %v784_v38  ;;  %1076 = vmatpush.msra.mxu0 %v925_v36  ;;  %v899_v38 = vld [vmem:[%s3180_s10] sm:$0xff]  ;;  %s1923_s10 = smov 32  }
 0x1bd   :  { %1277 = vmatpush.msrb.mxu2 %v925_v36 }
 0x1be   :  { %1077 = vmatpush.msra.mxu0 %v924_v25 }
 0x1bf   :  { %1278 = vmatpush.msrb.mxu2 %v924_v25 }
 0x1c0   :  { %1078 = vmatpush.msra.mxu0 %v923_v7 }
 0x1c1   :  { %1800 = vmatmul.msk.f32.gmra.mxu0 %vm793_vm1, %v2768_v27  ;;  %1804 = vmatmul.msk.f32.gmra.mxu1 %vm793_vm1, %v2768_v27 }
 0x1c2   :  { %1808 = vmatmul.msk.f32.gmra.mxu2 %vm793_vm1, %v2768_v27  ;;  %1079 = vmatpush.msra.mxu0 %v922_v54 }
 0x1c3   :  { %1279 = vmatpush.msrb.mxu2 %v923_v7 }
 0x1c4   :  { %1080 = vmatpush.msra.mxu0 %v921_v62 }
 0x1c5   :  { %1280 = vmatpush.msrb.mxu2 %v922_v54 }
 0x1c6   :  { %1081 = vmatpush.msra.mxu0 %v920_v51 }
 0x1c7   :  { %1281 = vmatpush.msrb.mxu2 %v921_v62 }
 0x1c8   :  { %1082 = vmatpush.msra.mxu0 %v919_v34 }
 0x1c9   :  { %1801 = vmatmul.msk.f32.gmra.mxu0 %vm793_vm1, %v2777_v5  ;;  %1805 = vmatmul.msk.f32.gmra.mxu1 %vm793_vm1, %v2777_v5 }
 0x1ca   :  { %1809 = vmatmul.msk.f32.gmra.mxu2 %vm793_vm1, %v2777_v5  ;;  %1083 = vmatpush.msra.mxu0 %v918_v32 }
 0x1cb   :  { %1282 = vmatpush.msrb.mxu2 %v920_v51 }
 0x1cc   :  { %1084 = vmatpush.msra.mxu0 %v917_v55 }
 0x1cd   :  { %1283 = vmatpush.msrb.mxu2 %v919_v34 }
 0x1ce   :  { %1085 = vmatpush.msra.mxu0 %v916_v41 }
 0x1cf   :  { %1284 = vmatpush.msrb.mxu2 %v918_v32 }
 0x1d0   :  { %1086 = vmatpush.msra.mxu0 %v915_v47 }
 0x1d1   :  { %1802 = vmatmul.msk.f32.gmra.mxu0 %vm793_vm1, %v2786_v10  ;;  %1806 = vmatmul.msk.f32.gmra.mxu1 %vm793_vm1, %v2786_v10 }
 0x1d2   :  { %1810 = vmatmul.msk.f32.gmra.mxu2 %vm793_vm1, %v2786_v10 }
 0x1d3   :  { %1285 = vmatpush.msrb.mxu2 %v917_v55 }
 0x1d5   :  { %1286 = vmatpush.msrb.mxu2 %v916_v41 }
 0x1d7   :  { %1287 = vmatpush.msrb.mxu2 %v915_v47 }
 0x236   :  { %v854_v40 = vpop.f32.mrf.mxu1 }
 0x237   :  { %933 = vxpose.xlu0.b32.start [1/2] (short) (narrow) %v854_v40, 16 }
 0x23d   :  { %v2842_v43 = vpop.f32.mrf.mxu2 }
 0x23e   :  { %v857_v16 = vpop.f32.mrf.mxu1  ;;  %v1114_v26 = vmul.f32 %v913_v44, %v2842_v43  ;;  %v1112_v63 = vmul.f32 %v911_v48, %v2842_v43  ;;  %v1110_v11 = vmul.f32 %v909_v19, %v2842_v43  ;;  %v1108_v20 = vmul.f32 %v907_v28, %v2842_v43 }
 0x23f   :  { %934 = vxpose.xlu0.b32.end [2/2] (short) (narrow) %v857_v16, 16  ;;  %v1106_v2 = vmul.f32 %v905_v17, %v2842_v43  ;;  %v1104_v22 = vmul.f32 %v903_v42, %v2842_v43  ;;  %v1102_v39 = vmul.f32 %v901_v31, %v2842_v43  ;;  %v1100_v56 = vmul.f32 %v899_v38, %v2842_v43 }
 0x245   :  { %v888_v46 = vpop.f32.mrf.mxu2 }
 0x246   :  { %v860_v35 = vpop.f32.mrf.mxu1  ;;  %v1115_v4 = vmul.f32 %v914_v21, %v888_v46  ;;  %v1113_v53 = vmul.f32 %v912_v59, %v888_v46  ;;  %v1111_v6 = vmul.f32 %v910_v14, %v888_v46  ;;  %v1109_v0 = vmul.f32 %v908_v58, %v888_v46 }
 0x247   :  { %1139 = vxpose.xlu1.b32.start [1/2] (short) (narrow) %v860_v35, 16  ;;  %v1107_v37 = vmul.f32 %v906_v24, %v888_v46  ;;  %v1105_v13 = vmul.f32 %v904_v57, %v888_v46  ;;  %v1103_v18 = vmul.f32 %v902_v1, %v888_v46  ;;  %v1101_v23 = vmul.f32 %v900_v30, %v888_v46 }
 0x248   :  { %1116 = vmatpush.msra.mxu1 %v1115_v4 }
 0x24a   :  { %1117 = vmatpush.msra.mxu1 %v1114_v26 }
 0x24c   :  { %1118 = vmatpush.msra.mxu1 %v1113_v53 }
 0x24d   :  { %v2861_v8 = vpop.f32.mrf.mxu2 }
 0x24e   :  { %1119 = vmatpush.msra.mxu1 %v1112_v63  ;;  %v863_v49 = vpop.f32.mrf.mxu1  ;;  %v1315_v60 = vmul.f32 %v913_v44, %v2861_v8  ;;  %v1313_v33 = vmul.f32 %v911_v48, %v2861_v8  ;;  %v1311_v9 = vmul.f32 %v909_v19, %v2861_v8  ;;  %v1309_v15 = vmul.f32 %v907_v28, %v2861_v8 }
 0x24f   :  { %1140 = vxpose.xlu1.b32.end [2/2] (short) (narrow) %v863_v49, 16  ;;  %v1307_v36 = vmul.f32 %v905_v17, %v2861_v8  ;;  %v1305_v7 = vmul.f32 %v903_v42, %v2861_v8  ;;  %v1303_v62 = vmul.f32 %v901_v31, %v2861_v8  ;;  %v1301_v34 = vmul.f32 %v899_v38, %v2861_v8  ;;  %v823_v42 = vpop.f32.mrf.mxu0 }
 0x250   :  { %1120 = vmatpush.msra.mxu1 %v1111_v6 }
 0x252   :  { %1121 = vmatpush.msra.mxu1 %v1110_v11 }
 0x254   :  { %1122 = vmatpush.msra.mxu1 %v1109_v0 }
 0x255   :  { %v894_v3 = vpop.f32.mrf.mxu2 }
 0x256   :  { %1123 = vmatpush.msra.mxu1 %v1108_v20  ;;  %v1316_v52 = vmul.f32 %v914_v21, %v894_v3  ;;  %v1314_v61 = vmul.f32 %v912_v59, %v894_v3  ;;  %v1312_v50 = vmul.f32 %v910_v14, %v894_v3  ;;  %v1310_v12 = vmul.f32 %v908_v58, %v894_v3  ;;  %v898_v20 = vld [vmem:[%s3181_s9 + $0x8] sm:$0xff] }
 0x257   :  { %v1308_v45 = vmul.f32 %v906_v24, %v894_v3  ;;  %v1306_v25 = vmul.f32 %v904_v57, %v894_v3  ;;  %v1304_v54 = vmul.f32 %v902_v1, %v894_v3  ;;  %v1302_v51 = vmul.f32 %v900_v30, %v894_v3 }
 0x258   :  { %1124 = vmatpush.msra.mxu1 %v1107_v37  ;;  %1317 = vmatpush.msrb.mxu0 %v1316_v52 }
 0x25a   :  { %1125 = vmatpush.msra.mxu1 %v1106_v2  ;;  %1318 = vmatpush.msrb.mxu0 %v1315_v60  ;;  %v897_v2 = vld [vmem:[%s3181_s9] sm:$0xff] }
 0x25c   :  { %1126 = vmatpush.msra.mxu1 %v1105_v13  ;;  %1319 = vmatpush.msrb.mxu0 %v1314_v61 }
 0x25e   :  { %1127 = vmatpush.msra.mxu1 %v1104_v22  ;;  %1320 = vmatpush.msrb.mxu0 %v1313_v33  ;;  %v826_v22 = vpop.f32.mrf.mxu0 }
 0x260   :  { %1128 = vmatpush.msra.mxu1 %v1103_v18  ;;  %1321 = vmatpush.msrb.mxu0 %v1312_v50 }
 0x262   :  { %1129 = vmatpush.msra.mxu1 %v1102_v39  ;;  %1322 = vmatpush.msrb.mxu0 %v1311_v9 }
 0x264   :  { %1130 = vmatpush.msra.mxu1 %v1101_v23  ;;  %1323 = vmatpush.msrb.mxu0 %v1310_v12 }
 0x266   :  { %1131 = vmatpush.msra.mxu1 %v1100_v56  ;;  %1324 = vmatpush.msrb.mxu0 %v1309_v15 }
 0x268   :  { %1325 = vmatpush.msrb.mxu0 %v1308_v45 }
 0x26a   :  { %1326 = vmatpush.msrb.mxu0 %v1307_v36 }
 0x26c   :  { %1327 = vmatpush.msrb.mxu0 %v1306_v25 }
 0x26e   :  { %1328 = vmatpush.msrb.mxu0 %v1305_v7 }
 0x270   :  { %1329 = vmatpush.msrb.mxu0 %v1304_v54 }
 0x272   :  { %1330 = vmatpush.msrb.mxu0 %v1303_v62 }
 0x274   :  { %1331 = vmatpush.msrb.mxu0 %v1302_v51 }
 0x276   :  { %1332 = vmatpush.msrb.mxu0 %v1301_v34 }
 0x2db   :  { %v949_v32 = vpop.trf.xlu0 }
 0x2dc   :  { %973 = vrot.lane.b32.xlu2 %v949_v32, %s1923_s10  ;;  %967 = vrot.lane.b32.xlu0 %v949_v32, %s1924_s29 }
 0x2e3   :  { %v950_v55 = vpop.trf.xlu0 }
 0x2e4   :  { %979 = vrot.lane.b32.xlu2 %v949_v32, %s1925_s2  ;;  %981 = vrot.lane.b32.xlu1 %v950_v55, %s1925_s2 }
 0x2eb   :  { %v2914_v41 = vpop.trf.xlu1 }
 0x2ec   :  { %985 = vrot.lane.b32.xlu2 %v949_v32, %s1926_s5  ;;  %1173 = vrot.lane.b32.xlu1 %v2914_v41, %s1924_s29 }
 0x2ed   :  { %1197 = vrot.lane.b32.xlu0 %v2914_v41, %s1927_s1 }
 0x2f3   :  { %v2924_v40 = vpop.trf.xlu1 }
 0x2f4   :  { %991 = vrot.lane.b32.xlu2 %v949_v32, %s1927_s1  ;;  %1179 = vrot.lane.b32.xlu1 %v2914_v41, %s1923_s10 }
 0x2f5   :  { %1199 = vrot.lane.b32.xlu0 %v2924_v40, %s1927_s1 }
 0x2fc   :  { %997 = vrot.lane.b32.xlu2 %v949_v32, %s1928_s3  ;;  %1185 = vrot.lane.b32.xlu1 %v2914_v41, %s1925_s2 }
 0x2fd   :  { %1209 = vrot.lane.b32.xlu0 %v2914_v41, %s1929_s25 }
 0x304   :  { %1003 = vrot.lane.b32.xlu2 %v949_v32, %s1929_s25  ;;  %1205 = vrot.lane.b32.xlu1 %v2924_v40, %s1928_s3 }
 0x30c   :  { %969 = vrot.lane.b32.xlu2 %v950_v55, %s1924_s29  ;;  %1203 = vrot.lane.b32.xlu1 %v2914_v41, %s1928_s3 }
 0x314   :  { %975 = vrot.lane.b32.xlu2 %v950_v55, %s1923_s10 }
 0x31c   :  { %987 = vrot.lane.b32.xlu2 %v950_v55, %s1926_s5 }
 0x324   :  { %993 = vrot.lane.b32.xlu2 %v950_v55, %s1927_s1 }
 0x32c   :  { %999 = vrot.lane.b32.xlu2 %v950_v55, %s1928_s3 }
 0x334   :  { %1005 = vrot.lane.b32.xlu2 %v950_v55, %s1929_s25 }
 0x336   :  { %v974_v47 = vpop.permute.xlu2 %973 }
 0x33c   :  { %1191 = vrot.lane.b32.xlu2 %v2914_v41, %s1926_s5 }
 0x33e   :  { %v980_v43 = vpop.permute.xlu2 %979 }
 0x344   :  { %1175 = vrot.lane.b32.xlu2 %v2924_v40, %s1924_s29 }
 0x346   :  { %v986_v16 = vpop.permute.xlu2 %985 }
 0x34c   :  { %1181 = vrot.lane.b32.xlu2 %v2924_v40, %s1923_s10 }
 0x34e   :  { %v992_v21 = vpop.permute.xlu2 %991  ;;  %v968_v46 = vpop.permute.xlu0 %967 }
 0x34f   :  { %v1009_v44 = vsel %vm793_vm1, %v949_v32, %v968_v46 }
 0x350   :  { %v1011_v35 = vsel %vm92_vm0, %v1009_v44, %v974_v47 }
 0x351   :  { %v1014_v4 = vsel %vm1013_vm5, %v1011_v35, %v980_v43 }
 0x352   :  { %v1017_v59 = vsel %vm1016_vm6, %v1014_v4, %v986_v16 }
 0x353   :  { %v1020_v26 = vsel %vm1019_vm9, %v1017_v59, %v992_v21  ;;  %v829_v21 = vpop.f32.mrf.mxu0 }
 0x354   :  { %1187 = vrot.lane.b32.xlu2 %v2924_v40, %s1925_s2 }
 0x356   :  { %v998_v48 = vpop.permute.xlu2 %997  ;;  %v982_v11 = vpop.permute.xlu1 %981 }
 0x357   :  { %v1023_v3 = vsel %vm1022_vm7, %v1020_v26, %v998_v48 }
 0x35b   :  { %v832_v44 = vpop.f32.mrf.mxu0 }
 0x35c   :  { %1193 = vrot.lane.b32.xlu2 %v2924_v40, %s1926_s5 }
 0x35e   :  { %v1004_v53 = vpop.permute.xlu2 %1003  ;;  %v1174_v61 = vpop.permute.xlu1 %1173 }
 0x35f   :  { %v1026_v52 = vsel %vm1025_vm8, %v1023_v3, %v1004_v53  ;;  %v1198_v30 = vpop.permute.xlu0 %1197  ;;  %v1215_v23 = vsel %vm793_vm1, %v2914_v41, %v1174_v61 }
 0x360   :  { %v1028_v13 = vmul.f32 %v1026_v52, %v897_v2 }
 0x364   :  { %1211 = vrot.lane.b32.xlu2 %v2924_v40, %s1929_s25 }
 0x366   :  { %v970_v14 = vpop.permute.xlu2 %969  ;;  %v1180_v33 = vpop.permute.xlu1 %1179 }
 0x367   :  { %v1010_v6 = vsel %vm793_vm1, %v950_v55, %v970_v14  ;;  %v1200_v38 = vpop.permute.xlu0 %1199  ;;  %v1217_v12 = vsel %vm92_vm0, %v1215_v23, %v1180_v33 }
 0x36e   :  { %v976_v63 = vpop.permute.xlu2 %975  ;;  %v1186_v50 = vpop.permute.xlu1 %1185 }
 0x36f   :  { %v1012_v58 = vsel %vm92_vm0, %v1010_v6, %v976_v63  ;;  %v1219_v56 = vsel %vm1013_vm5, %v1217_v12, %v1186_v50  ;;  %v1210_v55 = vpop.permute.xlu0 %1209 }
 0x370   :  { %v1015_v28 = vsel %vm1013_vm5, %v1012_v58, %v982_v11 }
 0x376   :  { %v988_v8 = vpop.permute.xlu2 %987  ;;  %v1206_v9 = vpop.permute.xlu1 %1205 }
 0x377   :  { %v1018_v0 = vsel %vm1016_vm6, %v1015_v28, %v988_v8 }
 0x37e   :  { %v994_v19 = vpop.permute.xlu2 %993  ;;  %v1204_v51 = vpop.permute.xlu1 %1203 }
 0x37f   :  { %v1021_v24 = vsel %vm1019_vm9, %v1018_v0, %v994_v19 }
 0x386   :  { %v1000_v49 = vpop.permute.xlu2 %999 }
 0x387   :  { %v1024_v17 = vsel %vm1022_vm7, %v1021_v24, %v1000_v49 }
 0x38e   :  { %v1006_v37 = vpop.permute.xlu2 %1005 }
 0x38f   :  { %v1027_v57 = vsel %vm1025_vm8, %v1024_v17, %v1006_v37 }
 0x390   :  { %v1029_v60 = vmul.f32 %v1027_v57, %v898_v20 }
 0x392   :  { %1050 = vmatpush.msrb.mxu3 %v1029_v60 }
 0x394   :  { %1051 = vmatpush.msrb.mxu3 %v1028_v13  ;;  %v931_v13 = vld [vmem:[%s3182_s12] sm:$0xff] }
 0x395   :  { %1811 = vmatmul.msk.f32.vlgmr.msrb.gmra.mxu3 %vm793_vm1, %v823_v42 }
 0x396   :  { %v1192_v1 = vpop.permute.xlu2 %1191 }
 0x397   :  { %v1221_v45 = vsel %vm1016_vm6, %v1219_v56, %v1192_v1 }
 0x398   :  { %v1223_v62 = vsel %vm1019_vm9, %v1221_v45, %v1198_v30 }
 0x399   :  { %v1225_v32 = vsel %vm1022_vm7, %v1223_v62, %v1204_v51 }
 0x39a   :  { %v1227_v47 = vsel %vm1025_vm8, %v1225_v32, %v1210_v55  ;;  %v1930_v32 = vmov 16.0  }
 0x39b   :  { %v1229_v46 = vmul.f32 %v1227_v47, %v897_v2 }
 0x39d   :  { %1812 = vmatmul.msk.f32.gmra.mxu3 %vm793_vm1, %v826_v22 }
 0x39e   :  { %v1176_v31 = vpop.permute.xlu2 %1175 }
 0x39f   :  { %v1216_v15 = vsel %vm793_vm1, %v2924_v40, %v1176_v31  ;;  %v932_v31 = vld [vmem:[%s3182_s12 + $0x8] sm:$0xff] }
 0x3a6   :  { %v1182_v18 = vpop.permute.xlu2 %1181 }
 0x3a7   :  { %v1218_v36 = vsel %vm92_vm0, %v1216_v15, %v1182_v18 }
 0x3ae   :  { %v1188_v39 = vpop.permute.xlu2 %1187 }
 0x3af   :  { %v1220_v7 = vsel %vm1013_vm5, %v1218_v36, %v1188_v39 }
 0x3b6   :  { %v1194_v25 = vpop.permute.xlu2 %1193 }
 0x3b7   :  { %v1222_v54 = vsel %vm1016_vm6, %v1220_v7, %v1194_v25 }
 0x3b8   :  { %v1224_v34 = vsel %vm1019_vm9, %v1222_v54, %v1200_v38 }
 0x3b9   :  { %v1226_v40 = vsel %vm1022_vm7, %v1224_v34, %v1206_v9 }
 0x3be   :  { %v1212_v41 = vpop.permute.xlu2 %1211 }
 0x3bf   :  { %v1228_v43 = vsel %vm1025_vm8, %v1226_v40, %v1212_v41 }
 0x3c0   :  { %v1230_v16 = vmul.f32 %v1228_v43, %v898_v20 }
 0x3c2   :  { %1251 = vmatpush.msra.mxu3 %v1230_v16 }
 0x3c4   :  { %1252 = vmatpush.msra.mxu3 %v1229_v46 }
 0x3c5   :  { %1813 = vmatmul.msk.f32.vlgmr.msra.gmra.mxu3 %vm793_vm1, %v829_v21 }
 0x3cd   :  { %1814 = vmatmul.msk.f32.gmra.mxu3 %vm793_vm1, %v832_v44 }
 0x418   :  { %v1053_v35 = vpop.f32.mrf.mxu3 }
 0x419   :  { %v1059_v4 = vmul.f32 0.25, %v1053_v35 }
 0x41b   :  { %1061 = vmax.xlane.f32.xlu2 %v1059_v4 }
 0x420   :  { %v1056_v59 = vpop.f32.mrf.mxu3 }
 0x421   :  { %v1060_v26 = vmul.f32 0.25, %v1056_v59 }
 0x423   :  { %1063 = vmax.xlane.f32.xlu1 %v1060_v26 }
 0x448   :  { %v1254_v48 = vpop.f32.mrf.mxu3 }
 0x449   :  { %v1260_v53 = vmul.f32 0.25, %v1254_v48 }
 0x44b   :  { %1262 = vmax.xlane.f32.xlu0 %v1260_v53 }
 0x450   :  { %v1257_v14 = vpop.f32.mrf.mxu3 }
 0x451   :  { %v1261_v63 = vmul.f32 0.25, %v1257_v14 }
 0x453   :  { %1264 = vmax.xlane.f32.xlu2 %v1261_v63 }
 0x48e   :  { %v1062_v8 = vpop.xlane.xlu2 %1061 }
 0x48f   :  { %v1065_v19 = vsub.f32 %v1059_v4, %v1062_v8 }
 0x491   :  { %v1067_v49 = vmul.f32 1.442695, %v1065_v19 }
 0x493   :  { %1881 = vpow2.f32 %v1067_v49 }
 0x496   :  { %v1064_v6 = vpop.xlane.xlu1 %1063 }
 0x497   :  { %v1066_v58 = vsub.f32 %v1060_v26, %v1064_v6 }
 0x499   :  { %v1882_v11 = vpop.eup %1881  ;;  %v1069_v28 = vmul.f32 1.442695, %v1066_v58 }
 0x49a   :  { %1087 = vmatmul.f32.vlgmr.msra.gmra.mxu0 %v1882_v11 }
 0x49b   :  { %1883 = vpow2.f32 %v1069_v28 }
 0x4a1   :  { %v1884_v0 = vpop.eup %1883 }
 0x4a2   :  { %1090 = vmatmul.f32.gmra.mxu0 %v1884_v0 }
 0x4be   :  { %v1263_v24 = vpop.xlane.xlu0 %1262 }
 0x4bf   :  { %v1266_v20 = vsub.f32 %v1260_v53, %v1263_v24 }
 0x4c1   :  { %v1268_v3 = vmul.f32 1.442695, %v1266_v20 }
 0x4c3   :  { %1885 = vpow2.f32 %v1268_v3 }
 0x4c6   :  { %v1265_v17 = vpop.xlane.xlu2 %1264 }
 0x4c7   :  { %v1267_v37 = vsub.f32 %v1261_v63, %v1265_v17 }
 0x4c9   :  { %v1886_v52 = vpop.eup %1885  ;;  %v1270_v57 = vmul.f32 1.442695, %v1267_v37 }
 0x4ca   :  { %1288 = vmatmul.f32.vlgmr.msrb.gmra.mxu2 %v1886_v52 }
 0x4cb   :  { %1887 = vpow2.f32 %v1270_v57 }
 0x4d1   :  { %v1888_v2 = vpop.eup %1887 }
 0x4d2   :  { %1291 = vmatmul.f32.gmra.mxu2 %v1888_v2 }
 0x517   :  { %v1088_v60 = vpop.f32.mrf.mxu0 }
 0x518   :  { %1889 = vrcp.f32 %v1088_v60 }
 0x51e   :  { %v1890_v42 = vpop.eup %1889 }
 0x51f   :  { %v1096_v61 = vmul.f32 %v1890_v42, %v1882_v11  ;;  %v1091_v1 = vpop.f32.mrf.mxu0 }
 0x520   :  { %1891 = vrcp.f32 %v1091_v1 }
 0x521   :  { %v1098_v22 = vadd.f32 %v1096_v61, %v931_v13 }
 0x523   :  { %1132 = vmatmul.f32.vlgmr.msra.gmra.mxu1 %v1098_v22 }
 0x526   :  { %v1892_v33 = vpop.eup %1891 }
 0x527   :  { %v1097_v18 = vmul.f32 %v1892_v33, %v1884_v0 }
 0x529   :  { %v1099_v50 = vadd.f32 %v1097_v18, %v932_v31 }
 0x52b   :  { %1135 = vmatmul.f32.gmra.mxu1 %v1099_v50 }
 0x54d   :  { %v1289_v30 = vpop.f32.mrf.mxu2 }
 0x54e   :  { %1893 = vrcp.f32 %v1289_v30 }
 0x554   :  { %v1894_v39 = vpop.eup %1893 }
 0x555   :  { %v1297_v9 = vmul.f32 %v1894_v39, %v1886_v52  ;;  %v1292_v38 = vpop.f32.mrf.mxu2  ;;  %v1850_v39 = vld [vmem:[%s3184_s14] ss:$0 sm:$0xff] }
 0x556   :  { %1895 = vrcp.f32 %v1292_v38 }
 0x557   :  { %v1299_v23 = vadd.f32 %v1297_v9, %v931_v13  ;;  %1897 = vrcp.f32 %v1930_v32 }
 0x559   :  { %1333 = vmatmul.f32.vlgmr.msrb.gmra.mxu0 %v1299_v23 }
 0x55c   :  { %v1896_v12 = vpop.eup %1895 }
 0x55d   :  { %v1298_v56 = vmul.f32 %v1896_v12, %v1888_v2  ;;  %v1898_v55 = vpop.eup %1897 }
 0x55e   :  { %v1355_v41 = vmul.f32 16.0, %v1898_v55  ;;  %vm1359_vm0 = vweird.f32 %v1898_v55 }
 0x55f   :  { %v1300_v15 = vadd.f32 %v1298_v56, %v932_v31  ;;  %v1849_v31 = vld [vmem:[%s3183_s13] ss:$0 sm:$0xff] }
 0x560   :  { %v1356_v40 = vsub.f32 1.0, %v1355_v41 }
 0x561   :  { %1336 = vmatmul.f32.gmra.mxu0 %v1300_v15 }
 0x562   :  { %v1357_v47 = vmul.f32 %v1898_v55, %v1356_v40 }
 0x564   :  { %v1358_v43 = vadd.f32 %v1898_v55, %v1357_v47 }
 0x566   :  { %v2998_v16 = vsel %vm1359_vm0, %v1898_v55, %v1358_v43 }
 0x5a0   :  { %v1133_v45 = vpop.f32.mrf.mxu1 }
 0x5a1   :  { %v1342_v36 = vsel %vm793_vm1, %v1133_v45, 0.0 }
 0x5a2   :  { %1343 = vadd.xlane.f32.xlu1 %v1342_v36 }
 0x5a8   :  { %v1136_v25 = vpop.f32.mrf.mxu1 }
 0x5a9   :  { %v1345_v7 = vsel %vm793_vm1, %v1136_v25, 0.0 }
 0x5aa   :  { %1346 = vadd.xlane.f32.xlu0 %v1345_v7 }
 0x5d6   :  { %v1334_v54 = vpop.f32.mrf.mxu0 }
 0x5d7   :  { %v1348_v62 = vsel %vm793_vm1, %v1334_v54, 0.0 }
 0x5d8   :  { %1349 = vadd.xlane.f32.xlu2 %v1348_v62 }
 0x5de   :  { %v1337_v51 = vpop.f32.mrf.mxu0 }
 0x5df   :  { %v1351_v34 = vsel %vm793_vm1, %v1337_v51, 0.0 }
 0x5e0   :  { %1352 = vadd.xlane.f32.xlu1 %v1351_v34 }
 0x615   :  { %v1344_v21 = vpop.xlane.xlu1 %1343 }
 0x616   :  { %v1361_v46 = vmul.f32 %v2998_v16, %v1344_v21 }
 0x618   :  { %v1365_v44 = vsub.f32 %v1133_v45, %v1361_v46 }
 0x61a   :  { %v1369_v35 = vmul.f32 %v1365_v44, %v1365_v44 }
 0x61c   :  { %v1373_v4 = vsel %vm793_vm1, %v1369_v35, 0.0 }
 0x61d   :  { %1374 = vadd.xlane.f32.xlu0 %v1373_v4  ;;  %v1347_v59 = vpop.xlane.xlu0 %1346 }
 0x61e   :  { %v1362_v26 = vmul.f32 %v2998_v16, %v1347_v59 }
 0x620   :  { %v1366_v48 = vsub.f32 %v1136_v25, %v1362_v26 }
 0x622   :  { %v1370_v53 = vmul.f32 %v1366_v48, %v1366_v48 }
 0x624   :  { %v1376_v14 = vsel %vm793_vm1, %v1370_v53, 0.0 }
 0x625   :  { %1377 = vadd.xlane.f32.xlu2 %v1376_v14 }
 0x64b   :  { %v1350_v63 = vpop.xlane.xlu2 %1349 }
 0x64c   :  { %v1363_v8 = vmul.f32 %v2998_v16, %v1350_v63 }
 0x64e   :  { %v3005_v19 = vsub.f32 %v1334_v54, %v1363_v8 }
 0x650   :  { %v1371_v49 = vmul.f32 %v3005_v19, %v3005_v19 }
 0x652   :  { %v1379_v6 = vsel %vm793_vm1, %v1371_v49, 0.0 }
 0x653   :  { %1380 = vadd.xlane.f32.xlu1 %v1379_v6  ;;  %v1353_v58 = vpop.xlane.xlu1 %1352 }
 0x654   :  { %v1364_v11 = vmul.f32 %v2998_v16, %v1353_v58 }
 0x656   :  { %v3011_v28 = vsub.f32 %v1337_v51, %v1364_v11 }
 0x658   :  { %v1372_v0 = vmul.f32 %v3011_v28, %v3011_v28 }
 0x65a   :  { %v1382_v24 = vsel %vm793_vm1, %v1372_v0, 0.0 }
 0x65b   :  { %1383 = vadd.xlane.f32.xlu0 %v1382_v24 }
 0x690   :  { %v1375_v20 = vpop.xlane.xlu0 %1374 }
 0x691   :  { %v1385_v3 = vmul.f32 %v1375_v20, %v2998_v16 }
 0x693   :  { %v1389_v17 = vadd.f32 1e-05, %v1385_v3 }
 0x695   :  { %1899 = vrsqrt.f32 %v1389_v17  ;;  %vm1399_vm11 = vweird.f32 %v1389_v17 }
 0x698   :  { %v1378_v37 = vpop.xlane.xlu2 %1377 }
 0x699   :  { %v1386_v52 = vmul.f32 %v1378_v37, %v2998_v16 }
 0x69b   :  { %v1900_v57 = vpop.eup %1899  ;;  %v1390_v2 = vadd.f32 1e-05, %v1386_v52 }
 0x69c   :  { %v1394_v60 = vmul.f32 %v1900_v57, %v1389_v17  ;;  %vm1400_vm10 = vweird.f32 %v1900_v57 }
 0x69d   :  { %1901 = vrsqrt.f32 %v1390_v2  ;;  %vm1401_vm12 = vmor %vm1399_vm11, %vm1400_vm10  ;;  %vm1409_vm14 = vweird.f32 %v1390_v2 }
 0x69e   :  { %v1395_v42 = vmul.f32 %v1900_v57, %v1394_v60 }
 0x6a0   :  { %v1396_v13 = vmul.f32 0.5, %v1395_v42 }
 0x6a2   :  { %v1397_v61 = vsub.f32 1.5, %v1396_v13 }
 0x6a3   :  { %v1902_v1 = vpop.eup %1901 }
 0x6a4   :  { %v1398_v22 = vmul.f32 %v1900_v57, %v1397_v61  ;;  %v1404_v33 = vmul.f32 %v1902_v1, %v1390_v2  ;;  %vm1410_vm13 = vweird.f32 %v1902_v1 }
 0x6a5   :  { %vm1411_vm15 = vmor %vm1409_vm14, %vm1410_vm13 }
 0x6a6   :  { %v1402_v18 = vsel %vm1401_vm12, %v1900_v57, %v1398_v22  ;;  %v1405_v50 = vmul.f32 %v1902_v1, %v1404_v33 }
 0x6a7   :  { %v1433_v30 = vmul.f32 %v1402_v18, %v1365_v44 }
 0x6a8   :  { %v1406_v9 = vmul.f32 0.5, %v1405_v50 }
 0x6a9   :  { %v1440_v38 = vmul.f32 %v1849_v31, %v1433_v30 }
 0x6aa   :  { %v1407_v23 = vsub.f32 1.5, %v1406_v9  ;;  %v1560_v9 = vld [vmem:[%s3188_s17 + $0x8] sm:$0xff] }
 0x6ab   :  { %v1447_v12 = vadd.f32 %v1850_v39, %v1440_v38  ;;  %v1559_v38 = vld [vmem:[%s3188_s17] sm:$0xff]  ;;  %1591 = vmatpush.msrb.mxu1 %v1560_v9  ;;  %v1611_v9 = vld [vmem:[%s3189_s19 + $0x8] sm:$0xff] }
 0x6ac   :  { %v1408_v56 = vmul.f32 %v1902_v1, %v1407_v23 }
 0x6ad   :  { %v1451_v15 = vadd.f32 %v1447_v12, %v2754_v29  ;;  %1592 = vmatpush.msrb.mxu1 %v1559_v38  ;;  %v1610_v38 = vld [vmem:[%s3189_s19] sm:$0xff] }
 0x6ae   :  { %v1412_v45 = vsel %vm1411_vm15, %v1902_v1, %v1408_v56 }
 0x6af   :  { %v1457_v36 = vsel %vm793_vm1, %v1451_v15, 0.0  ;;  %v1434_v25 = vmul.f32 %v1412_v45, %v1366_v48 }
 0x6b0   :  { %1458 = vadd.xlane.f32.xlu2 %v1457_v36 }
 0x6b1   :  { %v1441_v7 = vmul.f32 %v1849_v31, %v1434_v25 }
 0x6b3   :  { %v1448_v54 = vadd.f32 %v1850_v39, %v1441_v7 }
 0x6b5   :  { %v1452_v62 = vadd.f32 %v1448_v54, %v2768_v27 }
 0x6b7   :  { %v1460_v51 = vsel %vm793_vm1, %v1452_v62, 0.0 }
 0x6b8   :  { %1461 = vadd.xlane.f32.xlu1 %v1460_v51 }
 0x6c6   :  { %v1381_v34 = vpop.xlane.xlu1 %1380 }
 0x6c7   :  { %v1387_v32 = vmul.f32 %v1381_v34, %v2998_v16 }
 0x6c9   :  { %v1391_v55 = vadd.f32 1e-05, %v1387_v32 }
 0x6cb   :  { %1903 = vrsqrt.f32 %v1391_v55  ;;  %vm1419_vm3 = vweird.f32 %v1391_v55 }
 0x6ce   :  { %v1384_v41 = vpop.xlane.xlu0 %1383 }
 0x6cf   :  { %v1388_v29 = vmul.f32 %v1384_v41, %v2998_v16  ;;  %v3063_v41 = vld [vmem:[%s3185_s15] ss:$0 sm:$0xff] }
 0x6d1   :  { %v1904_v40 = vpop.eup %1903  ;;  %v1392_v47 = vadd.f32 1e-05, %v1388_v29 }
 0x6d2   :  { %v1414_v43 = vmul.f32 %v1904_v40, %v1391_v55  ;;  %vm1420_vm2 = vweird.f32 %v1904_v40 }
 0x6d3   :  { %1905 = vrsqrt.f32 %v1392_v47  ;;  %vm1421_vm4 = vmor %vm1419_vm3, %vm1420_vm2  ;;  %vm1429_vm9 = vweird.f32 %v1392_v47 }
 0x6d4   :  { %v1415_v21 = vmul.f32 %v1904_v40, %v1414_v43  ;;  %v1852_v43 = vld [vmem:[%s3186_s16] ss:$0 sm:$0xff] }
 0x6d6   :  { %v1416_v46 = vmul.f32 0.5, %v1415_v21 }
 0x6d8   :  { %v1417_v44 = vsub.f32 1.5, %v1416_v46 }
 0x6d9   :  { %v1906_v27 = vpop.eup %1905 }
 0x6da   :  { %v1418_v35 = vmul.f32 %v1904_v40, %v1417_v44  ;;  %v1424_v4 = vmul.f32 %v1906_v27, %v1392_v47  ;;  %vm1430_vm5 = vweird.f32 %v1906_v27 }
 0x6db   :  { %vm1431_vm7 = vmor %vm1429_vm9, %vm1430_vm5 }
 0x6dc   :  { %v1422_v59 = vsel %vm1421_vm4, %v1904_v40, %v1418_v35  ;;  %v1425_v26 = vmul.f32 %v1906_v27, %v1424_v4 }
 0x6dd   :  { %v1435_v48 = vmul.f32 %v1422_v59, %v3005_v19 }
 0x6de   :  { %v1426_v53 = vmul.f32 0.5, %v1425_v26 }
 0x6df   :  { %v1442_v14 = vmul.f32 %v1849_v31, %v1435_v48 }
 0x6e0   :  { %v1427_v63 = vsub.f32 1.5, %v1426_v53 }
 0x6e1   :  { %v1449_v8 = vadd.f32 %v1850_v39, %v1442_v14 }
 0x6e2   :  { %v1428_v49 = vmul.f32 %v1906_v27, %v1427_v63 }
 0x6e3   :  { %v1453_v6 = vadd.f32 %v1449_v8, %v2777_v5  ;;  %v1617_v8 = vld [vmem:[%s3189_s19 + $0x38] sm:$0xff] }
 0x6e4   :  { %v1432_v58 = vsel %vm1431_vm7, %v1906_v27, %v1428_v49  ;;  %v1616_v49 = vld [vmem:[%s3189_s19 + $0x30] sm:$0xff]  ;;  %1642 = vmatpush.msrb.mxu3 %v1617_v8 }
 0x6e5   :  { %v1463_v11 = vsel %vm793_vm1, %v1453_v6, 0.0  ;;  %v1436_v0 = vmul.f32 %v1432_v58, %v3011_v28 }
 0x6e6   :  { %1464 = vadd.xlane.f32.xlu0 %v1463_v11  ;;  %1643 = vmatpush.msrb.mxu3 %v1616_v49 }
 0x6e7   :  { %v1443_v24 = vmul.f32 %v1849_v31, %v1436_v0  ;;  %v1614_v0 = vld [vmem:[%s3189_s19 + $0x20] sm:$0xff] }
 0x6e9   :  { %v1450_v20 = vadd.f32 %v1850_v39, %v1443_v24 }
 0x6eb   :  { %v1454_v19 = vadd.f32 %v1450_v20, %v2786_v10 }
 0x6ed   :  { %v1466_v3 = vsel %vm793_vm1, %v1454_v19, 0.0 }
 0x6ee   :  { %1467 = vadd.xlane.f32.xlu2 %v1466_v3 }
 0x723   :  { %v1459_v17 = vpop.xlane.xlu2 %1458 }
 0x724   :  { %v1469_v37 = vmul.f32 %v1459_v17, %v2998_v16 }
 0x726   :  { %v1473_v52 = vsub.f32 %v1451_v15, %v1469_v37 }
 0x728   :  { %v1477_v57 = vmul.f32 %v1473_v52, %v1473_v52 }
 0x72a   :  { %v1481_v5 = vsel %vm793_vm1, %v1477_v57, 0.0 }
 0x72b   :  { %v1462_v2 = vpop.xlane.xlu1 %1461  ;;  %1482 = vadd.xlane.f32.xlu1 %v1481_v5 }
 0x72c   :  { %v1470_v60 = vmul.f32 %v1462_v2, %v2998_v16 }
 0x72e   :  { %v1474_v28 = vsub.f32 %v1452_v62, %v1470_v60 }
 0x730   :  { %v1478_v42 = vmul.f32 %v1474_v28, %v1474_v28 }
 0x732   :  { %v1484_v13 = vsel %vm793_vm1, %v1478_v42, 0.0 }
 0x733   :  { %1485 = vadd.xlane.f32.xlu0 %v1484_v13 }
 0x759   :  { %v1465_v10 = vpop.xlane.xlu0 %1464 }
 0x75a   :  { %v1471_v61 = vmul.f32 %v1465_v10, %v2998_v16 }
 0x75c   :  { %v3041_v1 = vsub.f32 %v1453_v6, %v1471_v61  ;;  %v1615_v6 = vld [vmem:[%s3189_s19 + $0x28] sm:$0xff] }
 0x75d   :  { %1644 = vmatpush.msrb.mxu3 %v1615_v6 }
 0x75e   :  { %v1479_v22 = vmul.f32 %v3041_v1, %v3041_v1 }
 0x75f   :  { %1645 = vmatpush.msrb.mxu3 %v1614_v0 }
 0x760   :  { %v1487_v33 = vsel %vm793_vm1, %v1479_v22, 0.0 }
 0x761   :  { %v1468_v31 = vpop.xlane.xlu2 %1467  ;;  %1488 = vadd.xlane.f32.xlu2 %v1487_v33 }
 0x762   :  { %v1472_v18 = vmul.f32 %v1468_v31, %v2998_v16 }
 0x764   :  { %v3047_v50 = vsub.f32 %v1454_v19, %v1472_v18  ;;  %v1613_v19 = vld [vmem:[%s3189_s19 + $0x18] sm:$0xff] }
 0x765   :  { %1646 = vmatpush.msrb.mxu3 %v1613_v19 }
 0x766   :  { %v1480_v30 = vmul.f32 %v3047_v50, %v3047_v50 }
 0x768   :  { %v1490_v39 = vsel %vm793_vm1, %v1480_v30, 0.0 }
 0x769   :  { %1491 = vadd.xlane.f32.xlu1 %v1490_v39 }
 0x79e   :  { %v1483_v23 = vpop.xlane.xlu1 %1482 }
 0x79f   :  { %v1493_v12 = vmul.f32 %v1483_v23, %v2998_v16 }
 0x7a1   :  { %v1497_v56 = vadd.f32 1e-05, %v1493_v12 }
 0x7a3   :  { %1907 = vrsqrt.f32 %v1497_v56  ;;  %vm1507_vm0 = vweird.f32 %v1497_v56 }
 0x7a6   :  { %v1486_v15 = vpop.xlane.xlu0 %1485 }
 0x7a7   :  { %v1494_v45 = vmul.f32 %v1486_v15, %v2998_v16 }
 0x7a9   :  { %v1908_v36 = vpop.eup %1907  ;;  %v1498_v25 = vadd.f32 1e-05, %v1494_v45 }
 0x7aa   :  { %v1502_v7 = vmul.f32 %v1908_v36, %v1497_v56  ;;  %vm1508_vm8 = vweird.f32 %v1908_v36 }
 0x7ab   :  { %1909 = vrsqrt.f32 %v1498_v25  ;;  %vm1509_vm10 = vmor %vm1507_vm0, %vm1508_vm8  ;;  %vm1517_vm12 = vweird.f32 %v1498_v25 }
 0x7ac   :  { %v1503_v54 = vmul.f32 %v1908_v36, %v1502_v7 }
 0x7ae   :  { %v1504_v62 = vmul.f32 0.5, %v1503_v54 }
 0x7b0   :  { %v1505_v51 = vsub.f32 1.5, %v1504_v62 }
 0x7b1   :  { %v1910_v34 = vpop.eup %1909 }
 0x7b2   :  { %v1506_v32 = vmul.f32 %v1908_v36, %v1505_v51  ;;  %v1512_v55 = vmul.f32 %v1910_v34, %v1498_v25  ;;  %vm1518_vm11 = vweird.f32 %v1910_v34 }
 0x7b3   :  { %vm1519_vm13 = vmor %vm1517_vm12, %vm1518_vm11 }
 0x7b4   :  { %v1510_v29 = vsel %vm1509_vm10, %v1908_v36, %v1506_v32  ;;  %v1513_v40 = vmul.f32 %v1910_v34, %v1512_v55  ;;  %v1854_v32 = vld [vmem:[%s3190_s20] ss:$0 sm:$0xff] }
 0x7b5   :  { %v1541_v47 = vmul.f32 %v1510_v29, %v1473_v52 }
 0x7b6   :  { %v1514_v21 = vmul.f32 0.5, %v1513_v40 }
 0x7b7   :  { %v1548_v46 = vmul.f32 %v3063_v41, %v1541_v47 }
 0x7b8   :  { %v1515_v44 = vsub.f32 1.5, %v1514_v21 }
 0x7b9   :  { %v3069_v27 = vadd.f32 %v1852_v43, %v1548_v46 }
 0x7ba   :  { %v1516_v35 = vmul.f32 %v1910_v34, %v1515_v44 }
 0x7bb   :  { %1815 = vmatmul.msk.f32.vlgmr.msrb.gmra.mxu1 %vm793_vm1, %v3069_v27 }
 0x7bc   :  { %v1520_v4 = vsel %vm1519_vm13, %v1910_v34, %v1516_v35 }
 0x7bd   :  { %v1542_v59 = vmul.f32 %v1520_v4, %v1474_v28 }
 0x7bf   :  { %v1549_v26 = vmul.f32 %v3063_v41, %v1542_v59 }
 0x7c1   :  { %v3074_v48 = vadd.f32 %v1852_v43, %v1549_v26 }
 0x7c3   :  { %1816 = vmatmul.msk.f32.gmra.mxu1 %vm793_vm1, %v3074_v48 }
 0x7d4   :  { %v1489_v53 = vpop.xlane.xlu2 %1488 }
 0x7d5   :  { %v1495_v14 = vmul.f32 %v1489_v53, %v2998_v16 }
 0x7d7   :  { %v1499_v63 = vadd.f32 1e-05, %v1495_v14 }
 0x7d9   :  { %1911 = vrsqrt.f32 %v1499_v63  ;;  %vm1527_vm15 = vweird.f32 %v1499_v63 }
 0x7dc   :  { %v1492_v58 = vpop.xlane.xlu1 %1491 }
 0x7dd   :  { %v1496_v11 = vmul.f32 %v1492_v58, %v2998_v16 }
 0x7df   :  { %v1912_v24 = vpop.eup %1911  ;;  %v1500_v20 = vadd.f32 1e-05, %v1496_v11 }
 0x7e0   :  { %v1522_v3 = vmul.f32 %v1912_v24, %v1499_v63  ;;  %vm1528_vm14 = vweird.f32 %v1912_v24 }
 0x7e1   :  { %1913 = vrsqrt.f32 %v1500_v20  ;;  %vm1529_vm2 = vmor %vm1527_vm15, %vm1528_vm14  ;;  %vm1537_vm4 = vweird.f32 %v1500_v20 }
 0x7e2   :  { %v1523_v17 = vmul.f32 %v1912_v24, %v1522_v3 }
 0x7e4   :  { %v1524_v37 = vmul.f32 0.5, %v1523_v17 }
 0x7e6   :  { %v1525_v52 = vsub.f32 1.5, %v1524_v37 }
 0x7e7   :  { %v1914_v57 = vpop.eup %1913 }
 0x7e8   :  { %v1526_v5 = vmul.f32 %v1912_v24, %v1525_v52  ;;  %v1532_v2 = vmul.f32 %v1914_v57, %v1500_v20  ;;  %vm1538_vm3 = vweird.f32 %v1914_v57 }
 0x7e9   :  { %vm1539_vm5 = vmor %vm1537_vm4, %vm1538_vm3 }
 0x7ea   :  { %v1530_v60 = vsel %vm1529_vm2, %v1912_v24, %v1526_v5  ;;  %v1533_v28 = vmul.f32 %v1914_v57, %v1532_v2 }
 0x7eb   :  { %v1543_v42 = vmul.f32 %v1530_v60, %v3041_v1  ;;  %v1612_v1 = vld [vmem:[%s3189_s19 + $0x10] sm:$0xff] }
 0x7ec   :  { %v1534_v13 = vmul.f32 0.5, %v1533_v28  ;;  %1647 = vmatpush.msrb.mxu3 %v1612_v1 }
 0x7ed   :  { %v1550_v10 = vmul.f32 %v3063_v41, %v1543_v42 }
 0x7ee   :  { %v1535_v61 = vsub.f32 1.5, %v1534_v13  ;;  %1648 = vmatpush.msrb.mxu3 %v1611_v9 }
 0x7ef   :  { %v1557_v22 = vadd.f32 %v1852_v43, %v1550_v10 }
 0x7f0   :  { %v1536_v33 = vmul.f32 %v1914_v57, %v1535_v61  ;;  %1649 = vmatpush.msrb.mxu3 %v1610_v38 }
 0x7f1   :  { %1817 = vmatmul.msk.f32.gmra.mxu1 %vm793_vm1, %v1557_v22 }
 0x7f2   :  { %v1540_v31 = vsel %vm1539_vm5, %v1914_v57, %v1536_v33 }
 0x7f3   :  { %v1544_v18 = vmul.f32 %v1540_v31, %v3047_v50  ;;  %v1853_v50 = vld [vmem:[%s3187_s18] ss:$0 sm:$0xff] }
 0x7f5   :  { %v1551_v30 = vmul.f32 %v3063_v41, %v1544_v18 }
 0x7f7   :  { %v1558_v39 = vadd.f32 %v1852_v43, %v1551_v30 }
 0x7f9   :  { %1818 = vmatmul.msk.f32.gmra.mxu1 %vm793_vm1, %v1558_v39 }
 0x838   :  { %v1594_v23 = vpop.f32.mrf.mxu1 }
 0x839   :  { %v1595_v12 = vadd.f32 %v1853_v50, %v1594_v23  ;;  %v1855_v23 = vld [vmem:[%s3191_s21] ss:$0 sm:$0xff] }
 0x83b   :  { %v1606_v56 = vmax.f32 %v1595_v12, 0.0 }
 0x83d   :  { %1819 = vmatmul.msk.f32.vlgmr.msrb.gmra.mxu3 %vm1016_vm6, %v1606_v56 }
 0x840   :  { %v1597_v15 = vpop.f32.mrf.mxu1 }
 0x841   :  { %v1598_v45 = vadd.f32 %v1853_v50, %v1597_v15  ;;  %v1856_v15 = vld [vmem:[%s3192_s22] ss:$0 sm:$0xff] }
 0x843   :  { %v1607_v36 = vmax.f32 %v1598_v45, 0.0 }
 0x845   :  { %1820 = vmatmul.msk.f32.gmra.mxu3 %vm1016_vm6, %v1607_v36 }
 0x86e   :  { %v1600_v25 = vpop.f32.mrf.mxu1 }
 0x86f   :  { %v1601_v7 = vadd.f32 %v1853_v50, %v1600_v25 }
 0x871   :  { %v1608_v54 = vmax.f32 %v1601_v7, 0.0 }
 0x873   :  { %1821 = vmatmul.msk.f32.gmra.mxu3 %vm1016_vm6, %v1608_v54 }
 0x876   :  { %v1603_v62 = vpop.f32.mrf.mxu1 }
 0x877   :  { %v1604_v51 = vadd.f32 %v1853_v50, %v1603_v62 }
 0x879   :  { %v1609_v34 = vmax.f32 %v1604_v51, 0.0 }
 0x87b   :  { %1822 = vmatmul.msk.f32.gmra.mxu3 %vm1016_vm6, %v1609_v34 }
 0x8c0   :  { %v1651_v55 = vpop.f32.mrf.mxu3 }
 0x8c1   :  { %v1652_v41 = vadd.f32 %v1854_v32, %v1651_v55 }
 0x8c3   :  { %v1663_v29 = vadd.f32 %v1652_v41, %v3069_v27 }
 0x8c5   :  { %v1669_v40 = vsel %vm793_vm1, %v1663_v29, 0.0 }
 0x8c6   :  { %1670 = vadd.xlane.f32.xlu0 %v1669_v40 }
 0x8c8   :  { %v1654_v47 = vpop.f32.mrf.mxu3 }
 0x8c9   :  { %v1655_v43 = vadd.f32 %v1854_v32, %v1654_v47 }
 0x8cb   :  { %v1664_v21 = vadd.f32 %v1655_v43, %v3074_v48 }
 0x8cd   :  { %v1672_v46 = vsel %vm793_vm1, %v1664_v21, 0.0 }
 0x8ce   :  { %1673 = vadd.xlane.f32.xlu2 %v1672_v46 }
 0x8f6   :  { %v1657_v44 = vpop.f32.mrf.mxu3 }
 0x8f7   :  { %v1658_v35 = vadd.f32 %v1854_v32, %v1657_v44 }
 0x8f9   :  { %v1665_v4 = vadd.f32 %v1658_v35, %v1557_v22 }
 0x8fb   :  { %v1675_v59 = vsel %vm793_vm1, %v1665_v4, 0.0 }
 0x8fc   :  { %1676 = vadd.xlane.f32.xlu1 %v1675_v59 }
 0x8fe   :  { %v1660_v26 = vpop.f32.mrf.mxu3 }
 0x8ff   :  { %v1661_v53 = vadd.f32 %v1854_v32, %v1660_v26 }
 0x901   :  { %v1666_v14 = vadd.f32 %v1661_v53, %v1558_v39 }
 0x903   :  { %v1678_v27 = vsel %vm793_vm1, %v1666_v14, 0.0 }
 0x904   :  { %1679 = vadd.xlane.f32.xlu0 %v1678_v27 }
 0x939   :  { %v1671_v63 = vpop.xlane.xlu0 %1670 }
 0x93a   :  { %v1681_v8 = vmul.f32 %v1671_v63, %v2998_v16 }
 0x93c   :  { %v1685_v49 = vsub.f32 %v1663_v29, %v1681_v8 }
 0x93e   :  { %v1689_v48 = vmul.f32 %v1685_v49, %v1685_v49 }
 0x940   :  { %v1693_v6 = vsel %vm793_vm1, %v1689_v48, 0.0 }
 0x941   :  { %v1674_v58 = vpop.xlane.xlu2 %1673  ;;  %1694 = vadd.xlane.f32.xlu2 %v1693_v6 }
 0x942   :  { %v1682_v11 = vmul.f32 %v1674_v58, %v2998_v16 }
 0x944   :  { %v1686_v0 = vsub.f32 %v1664_v21, %v1682_v11 }
 0x946   :  { %v1690_v24 = vmul.f32 %v1686_v0, %v1686_v0 }
 0x948   :  { %v1696_v20 = vsel %vm793_vm1, %v1690_v24, 0.0 }
 0x949   :  { %1697 = vadd.xlane.f32.xlu1 %v1696_v20 }
 0x96f   :  { %v1677_v19 = vpop.xlane.xlu1 %1676 }
 0x970   :  { %v1683_v3 = vmul.f32 %v1677_v19, %v2998_v16 }
 0x972   :  { %v3131_v17 = vsub.f32 %v1665_v4, %v1683_v3 }
 0x974   :  { %v1691_v37 = vmul.f32 %v3131_v17, %v3131_v17 }
 0x976   :  { %v1699_v52 = vsel %vm793_vm1, %v1691_v37, 0.0 }
 0x977   :  { %1700 = vadd.xlane.f32.xlu0 %v1699_v52  ;;  %v1680_v57 = vpop.xlane.xlu0 %1679 }
 0x978   :  { %v1684_v5 = vmul.f32 %v1680_v57, %v2998_v16 }
 0x97a   :  { %v3137_v2 = vsub.f32 %v1666_v14, %v1684_v5 }
 0x97c   :  { %v1692_v60 = vmul.f32 %v3137_v2, %v3137_v2 }
 0x97e   :  { %v1702_v28 = vsel %vm793_vm1, %v1692_v60, 0.0 }
 0x97f   :  { %1703 = vadd.xlane.f32.xlu2 %v1702_v28 }
 0x9b4   :  { %v1695_v42 = vpop.xlane.xlu2 %1694 }
 0x9b5   :  { %v1705_v13 = vmul.f32 %v1695_v42, %v2998_v16 }
 0x9b7   :  { %v1709_v10 = vadd.f32 1e-05, %v1705_v13 }
 0x9b9   :  { %1915 = vrsqrt.f32 %v1709_v10  ;;  %vm1719_vm9 = vweird.f32 %v1709_v10 }
 0x9bc   :  { %v1698_v61 = vpop.xlane.xlu1 %1697 }
 0x9bd   :  { %v1706_v22 = vmul.f32 %v1698_v61, %v2998_v16 }
 0x9bf   :  { %v1916_v33 = vpop.eup %1915  ;;  %v1710_v31 = vadd.f32 1e-05, %v1706_v22 }
 0x9c0   :  { %v1714_v18 = vmul.f32 %v1916_v33, %v1709_v10  ;;  %vm1720_vm6 = vweird.f32 %v1916_v33 }
 0x9c1   :  { %1917 = vrsqrt.f32 %v1710_v31  ;;  %vm1721_vm7 = vmor %vm1719_vm9, %vm1720_vm6  ;;  %vm1729_vm0 = vweird.f32 %v1710_v31 }
 0x9c2   :  { %v1715_v30 = vmul.f32 %v1916_v33, %v1714_v18 }
 0x9c4   :  { %v1716_v39 = vmul.f32 0.5, %v1715_v30 }
 0x9c6   :  { %v1717_v1 = vsub.f32 1.5, %v1716_v39 }
 0x9c7   :  { %v1918_v9 = vpop.eup %1917 }
 0x9c8   :  { %v1718_v38 = vmul.f32 %v1916_v33, %v1717_v1  ;;  %v1724_v50 = vmul.f32 %v1918_v9, %v1710_v31  ;;  %vm1730_vm8 = vweird.f32 %v1918_v9 }
 0x9c9   :  { %vm1731_vm10 = vmor %vm1729_vm0, %vm1730_vm8 }
 0x9ca   :  { %v1722_v12 = vsel %vm1721_vm7, %v1916_v33, %v1718_v38  ;;  %v1725_v56 = vmul.f32 %v1918_v9, %v1724_v50 }
 0x9cb   :  { %v1753_v45 = vmul.f32 %v1722_v12, %v1685_v49 }
 0x9cc   :  { %v1726_v36 = vmul.f32 0.5, %v1725_v56 }
 0x9cd   :  { %v1760_v25 = vmul.f32 %v1855_v23, %v1753_v45 }
 0x9ce   :  { %v1727_v7 = vsub.f32 1.5, %v1726_v36 }
 0x9cf   :  { %v1767_v54 = vadd.f32 %v1856_v15, %v1760_v25 }
 0x9d0   :  { %v1728_v62 = vmul.f32 %v1918_v9, %v1727_v7 }
 0x9d1   :  { %1771 = vst.msk [vmem:[%s3193_s23] sm:$0xff] %vm793_vm1, %v1767_v54 }
 0x9d2   :  { %v1732_v51 = vsel %vm1731_vm10, %v1918_v9, %v1728_v62 }
 0x9d3   :  { %v1754_v34 = vmul.f32 %v1732_v51, %v1686_v0 }
 0x9d5   :  { %v1761_v32 = vmul.f32 %v1855_v23, %v1754_v34 }
 0x9d7   :  { %v1768_v55 = vadd.f32 %v1856_v15, %v1761_v32 }
 0x9d9   :  { %1772 = vst.msk [vmem:[%s3193_s23 + $0x8] sm:$0xff] %vm793_vm1, %v1768_v55 }
 0x9ea   :  { %v1701_v41 = vpop.xlane.xlu0 %1700 }
 0x9eb   :  { %v1707_v29 = vmul.f32 %v1701_v41, %v2998_v16 }
 0x9ed   :  { %v1711_v40 = vadd.f32 1e-05, %v1707_v29 }
 0x9ef   :  { %1919 = vrsqrt.f32 %v1711_v40  ;;  %vm1739_vm12 = vweird.f32 %v1711_v40 }
 0x9f2   :  { %v1704_v47 = vpop.xlane.xlu2 %1703 }
 0x9f3   :  { %v1708_v43 = vmul.f32 %v1704_v47, %v2998_v16 }
 0x9f5   :  { %v1920_v21 = vpop.eup %1919  ;;  %v1712_v46 = vadd.f32 1e-05, %v1708_v43 }
 0x9f6   :  { %v1734_v44 = vmul.f32 %v1920_v21, %v1711_v40  ;;  %vm1740_vm11 = vweird.f32 %v1920_v21 }
 0x9f7   :  { %1921 = vrsqrt.f32 %v1712_v46  ;;  %vm1741_vm13 = vmor %vm1739_vm12, %vm1740_vm11  ;;  %vm1749_vm15 = vweird.f32 %v1712_v46 }
 0x9f8   :  { %v1735_v35 = vmul.f32 %v1920_v21, %v1734_v44 }
 0x9fa   :  { %v1736_v4 = vmul.f32 0.5, %v1735_v35 }
 0x9fc   :  { %v1737_v59 = vsub.f32 1.5, %v1736_v4 }
 0x9fd   :  { %v1922_v26 = vpop.eup %1921 }
 0x9fe   :  { %v1738_v53 = vmul.f32 %v1920_v21, %v1737_v59  ;;  %v1744_v14 = vmul.f32 %v1922_v26, %v1712_v46  ;;  %vm1750_vm14 = vweird.f32 %v1922_v26 }
 0x9ff   :  { %vm1751_vm2 = vmor %vm1749_vm15, %vm1750_vm14 }
 0xa00   :  { %v1742_v27 = vsel %vm1741_vm13, %v1920_v21, %v1738_v53  ;;  %v1745_v63 = vmul.f32 %v1922_v26, %v1744_v14 }
 0xa01   :  { %v1755_v8 = vmul.f32 %v1742_v27, %v3131_v17 }
 0xa02   :  { %v1746_v49 = vmul.f32 0.5, %v1745_v63 }
 0xa03   :  { %v1762_v48 = vmul.f32 %v1855_v23, %v1755_v8 }
 0xa04   :  { %v1747_v16 = vsub.f32 1.5, %v1746_v49 }
 0xa05   :  { %v1769_v6 = vadd.f32 %v1856_v15, %v1762_v48 }
 0xa06   :  { %v1748_v58 = vmul.f32 %v1922_v26, %v1747_v16 }
 0xa07   :  { %1773 = vst.msk [vmem:[%s3193_s23 + $0x10] sm:$0xff] %vm793_vm1, %v1769_v6 }
 0xa08   :  { %v1752_v11 = vsel %vm1751_vm2, %v1922_v26, %v1748_v58 }
 0xa09   :  { %v1756_v0 = vmul.f32 %v1752_v11, %v3137_v2 }
 0xa0b   :  { %v1763_v24 = vmul.f32 %v1855_v23, %v1756_v0 }
 0xa0d   :  { %v1770_v20 = vadd.f32 %v1856_v15, %v1763_v24 }
 0xa0f   :  { %1774 = vst.msk [vmem:[%s3193_s23 + $0x18] sm:$0xff] %vm793_vm1, %v1770_v20 }

</bundles_post_ra>
